<compile_context>
chip_gen: v6e
topology: v6e:2x2x1
jax: 0.10.0
libtpu: 0.0.40
codegen_flags: <defaults>
</compile_context>

<pallas_src>
import functools
import math

import jax
import jax.numpy as jnp
from jax.experimental import pallas as pl
from jax.experimental.pallas import tpu as pltpu

_VMEM_LIMIT = 64 * 1024 * 1024      # raise v5e/v6e/v7x scoped-VMEM defaults
_W_RESIDENT_BUDGET = 8 * 1024 * 1024  # keep resident weight tile <= 8 MiB


# ---------------------------------------------------------------------------
# In-kernel math helpers
# ---------------------------------------------------------------------------
def _erf(z):
    # Abramowitz & Stegun 7.1.26, |err| < 1.5e-7 (exact-erf GELU semantics).
    a1, a2, a3, a4, a5 = 0.254829592, -0.284496736, 1.421413741, -1.453152027, 1.061405429
    p = 0.3275911
    az = jnp.abs(z)
    t = 1.0 / (1.0 + p * az)
    poly = ((((a5 * t + a4) * t + a3) * t + a2) * t + a1) * t
    e = 1.0 - poly * jnp.exp(-az * az)
    return jnp.where(z >= 0, e, -e)


def _gelu_exact(x):
    # TODO(synk): if GELU VALU cost ever dominates a full-K single-step matmul,
    # switch to the tanh approximation (1 EUP op) gated on accuracy needs.
    return 0.5 * x * (1.0 + _erf(x * 0.7071067811865476))


def _dot(a, b):
    return jnp.dot(a, b, preferred_element_type=jnp.float32)


def _dot_kt(a, b):
    # a @ b.T without materializing the transpose (contract last dims).
    return jax.lax.dot_general(a, b, (((1,), (1,)), ((), ())),
                               preferred_element_type=jnp.float32)


# ---------------------------------------------------------------------------
# Host-side tiling helpers
# ---------------------------------------------------------------------------
def _pick_m_tile(M, cap=512):
    """Largest tile dividing M, multiple of 8, leaving >=2 tiles (megacore)
    when M is large enough.  Falls back to a single full block (always legal,
    since a block equal to the full array dims needs no alignment)."""
    if M <= 16:
        return M
    limit = max(8, min(cap, (M // 2) // 8 * 8))
    t = limit
    while t >= 8:
        if M % t == 0:
            return t
        t -= 8
    return M


def _pick_n_tile(N, K, itemsize, budget=_W_RESIDENT_BUDGET):
    """Full N (weight fully resident) unless the weight exceeds the budget;
    then the largest 128-multiple divisor of N that fits."""
    if K * N * itemsize <= budget or N <= 128:
        return N
    cap = max(128, (budget // (K * itemsize)) // 128 * 128)
    t = min(N // 128 * 128, cap)
    while t >= 128:
        if N % t == 0:
            return t
        t -= 128
    return N


# ---------------------------------------------------------------------------
# Kernel bodies
# ---------------------------------------------------------------------------
def _linear_kernel(x_ref, w_ref, b_ref, o_ref, *, activation):
    """o = act(x @ W + b); W is VMEM-resident (full K), single-shot."""
    y = _dot(x_ref[...], w_ref[...]) + b_ref[...].astype(jnp.float32)
    if activation == "gelu":
        y = _gelu_exact(y)
    o_ref[...] = y.astype(o_ref.dtype)


def _linear_res_ln_kernel(x_ref, w_ref, b_ref, r_ref, g_ref, bt_ref, o_ref, *, eps):
    """o = LayerNorm(res + x @ W + b), LN over the full last dim."""
    y = (_dot(x_ref[...], w_ref[...]) + b_ref[...].astype(jnp.float32)
         + r_ref[...].astype(jnp.float32))
    mu = jnp.mean(y, axis=-1, keepdims=True)
    d = y - mu
    var = jnp.mean(d * d, axis=-1, keepdims=True)
    y = d * jax.lax.rsqrt(var + eps)
    y = y * g_ref[...].astype(jnp.float32) + bt_ref[...].astype(jnp.float32)
    o_ref[...] = y.astype(o_ref.dtype)


def _mhsa_kernel(x_ref, wq_ref, wk_ref, wv_ref, bq_ref, bk_ref, bv_ref, o_ref,
                 *, scale, s_valid, approx_recip):
    """Fused QKV projection + softmax attention for one (batch, head) pair.

    x_ref: (1, S, E), wq/wk/wv: (1, E, Dh), bq/bk/bv: (1, 1, Dh),
    o_ref: (1, 1, S, Dh).  Head slicing happened on the DMA side (per-head
    weight blocks), so no sub-lane relayouts occur inside the kernel.
    """
    x = x_ref[0]                                             # (S, E)
    S = x.shape[0]
    q = (_dot(x, wq_ref[0]) + bq_ref[0]) * scale             # (S, Dh) f32
    k = _dot(x, wk_ref[0]) + bk_ref[0]
    v = _dot(x, wv_ref[0]) + bv_ref[0]

    s = _dot_kt(q.astype(x.dtype), k.astype(x.dtype))        # (S, S) f32
    if s_valid < S:                                          # mask padded keys
        col = jax.lax.broadcasted_iota(jnp.int32, (S, S), 1)
        s = jnp.where(col < s_valid, s, -1e30)
    s = s - jnp.max(s, axis=-1, keepdims=True)
    p = jnp.exp(s)
    p = p * pl.reciprocal(jnp.sum(p, axis=-1, keepdims=True), approx=approx_recip)
    out = _dot(p.astype(x.dtype), v.astype(x.dtype))         # (S, Dh) f32
    o_ref[0, 0] = out.astype(o_ref.dtype)


# ---------------------------------------------------------------------------
# pallas_call wrappers
# ---------------------------------------------------------------------------
def pallas_linear(x, w, b, activation=None, out_dtype=None, tm_cap=512):
    """y = act(x @ w + b).  x: [M, K], w: [K, N], b: [N].  Weight-resident."""
    M, K = x.shape
    N = w.shape[1]
    out_dtype = out_dtype if out_dtype is not None else x.dtype
    tm = _pick_m_tile(M, tm_cap)
    tn = _pick_n_tile(N, K, w.dtype.itemsize)
    itemsize = x.dtype.itemsize

    return pl.pallas_call(
        functools.partial(_linear_kernel, activation=activation),
        out_shape=jax.ShapeDtypeStruct((M, N), out_dtype),
        grid=(M // tm, N // tn),
        in_specs=[
            pl.BlockSpec((tm, K), lambda i, j: (i, 0)),
            pl.BlockSpec((K, tn), lambda i, j: (0, j)),
            pl.BlockSpec((1, tn), lambda i, j: (0, j)),
        ],
        out_specs=pl.BlockSpec((tm, tn), lambda i, j: (i, j)),
        compiler_params=pltpu.CompilerParams(
            dimension_semantics=("parallel", "parallel"),
            vmem_limit_bytes=_VMEM_LIMIT),
        cost_estimate=pl.CostEstimate(
            flops=2 * M * N * K,
            transcendentals=M * N if activation == "gelu" else 0,
            bytes_accessed=(M * K + K * N + M * N) * itemsize),
    )(x, w, b.reshape(1, N))


def pallas_linear_res_ln(x, w, b, res, gamma, beta, eps=1e-5, out_dtype=None,
                         tm_cap=512):
    """LayerNorm(res + x @ w + b) over the last dim, fused; weight-resident."""
    M, K = x.shape
    E = w.shape[1]
    out_dtype = out_dtype if out_dtype is not None else res.dtype
    tm = _pick_m_tile(M, tm_cap)
    itemsize = x.dtype.itemsize

    return pl.pallas_call(
        functools.partial(_linear_res_ln_kernel, eps=eps),
        out_shape=jax.ShapeDtypeStruct((M, E), out_dtype),
        grid=(M // tm,),
        in_specs=[
            pl.BlockSpec((tm, K), lambda i: (i, 0)),
            pl.BlockSpec((K, E), lambda i: (0, 0)),
            pl.BlockSpec((1, E), lambda i: (0, 0)),
            pl.BlockSpec((tm, E), lambda i: (i, 0)),
            pl.BlockSpec((1, E), lambda i: (0, 0)),
            pl.BlockSpec((1, E), lambda i: (0, 0)),
        ],
        out_specs=pl.BlockSpec((tm, E), lambda i: (i, 0)),
        compiler_params=pltpu.CompilerParams(
            dimension_semantics=("parallel",),
            vmem_limit_bytes=_VMEM_LIMIT),
        cost_estimate=pl.CostEstimate(
            flops=2 * M * E * K,
            transcendentals=0,
            bytes_accessed=(M * K + K * E + 3 * M * E) * itemsize),
    )(x, w, b.reshape(1, E), res, gamma.reshape(1, E), beta.reshape(1, E))


def pallas_mhsa(h, wq, wk, wv, bq, bk, bv, *, nhead, s_valid, out_dtype=None):
    """Fused QKV projection + multi-head self-attention.

    h: [B, S, E]; wq/wk/wv: [nhead, E, Dh]; bq/bk/bv: [nhead, 1, Dh].
    Returns [B, S, E].
    """
    B, S, E = h.shape
    Dh = E // nhead
    scale = 1.0 / math.sqrt(Dh)
    out_dtype = out_dtype if out_dtype is not None else h.dtype
    approx = jnp.dtype(out_dtype) == jnp.dtype(jnp.bfloat16)
    itemsize = h.dtype.itemsize

    out = pl.pallas_call(
        functools.partial(_mhsa_kernel, scale=scale, s_valid=s_valid,
                          approx_recip=approx),
        out_shape=jax.ShapeDtypeStruct((B, nhead, S, Dh), out_dtype),
        grid=(B, nhead),
        in_specs=[
            pl.BlockSpec((1, S, E), lambda b, hd: (b, 0, 0)),
            pl.BlockSpec((1, E, Dh), lambda b, hd: (hd, 0, 0)),
            pl.BlockSpec((1, E, Dh), lambda b, hd: (hd, 0, 0)),
            pl.BlockSpec((1, E, Dh), lambda b, hd: (hd, 0, 0)),
            pl.BlockSpec((1, 1, Dh), lambda b, hd: (hd, 0, 0)),
            pl.BlockSpec((1, 1, Dh), lambda b, hd: (hd, 0, 0)),
            pl.BlockSpec((1, 1, Dh), lambda b, hd: (hd, 0, 0)),
        ],
        out_specs=pl.BlockSpec((1, 1, S, Dh), lambda b, hd: (b, hd, 0, 0)),
        compiler_params=pltpu.CompilerParams(
            dimension_semantics=("parallel", "parallel"),
            vmem_limit_bytes=_VMEM_LIMIT),
        cost_estimate=pl.CostEstimate(
            flops=B * nhead * (6 * S * E * Dh + 4 * S * S * Dh),
            transcendentals=B * nhead * S * S,
            bytes_accessed=(B * S * E + B * 3 * E * E + B * S * E) * itemsize),
    )(h, wq, wk, wv, bq, bk, bv)
    # [B, nhead, S, Dh] -> [B, S, E] (small, lane-interleave handled by XLA)
    return out.transpose(0, 2, 1, 3).reshape(B, S, E)


# ---------------------------------------------------------------------------
# Model glue (reshapes / parameter plumbing in plain JAX)
# ---------------------------------------------------------------------------
def patchify(x, patch_size):
    # [B, C, H, W] -> [B, N, C*ph*pw], patch vector ordered (c, ph, pw)
    B, C, H, W = x.shape
    ph, pw = patch_size
    gh, gw = H // ph, W // pw
    x = x.reshape(B, C, gh, ph, gw, pw)
    x = x.transpose(0, 2, 4, 1, 3, 5)
    return x.reshape(B, gh * gw, C * ph * pw)


def encoder_layer(h, p, nhead, s_valid, cdt):
    # PyTorch nn.TransformerEncoderLayer, batch_first=True, norm_first=False, eval.
    B, S, E = h.shape
    x2 = h.reshape(B * S, E)

    attn = pallas_mhsa(h, p["wq"], p["wk"], p["wv"], p["bq"], p["bk"], p["bv"],
                       nhead=nhead, s_valid=s_valid, out_dtype=cdt)
    attn2 = attn.reshape(B * S, E)

    # norm1(x + out_proj(attn)) fused into the out-projection matmul.
    x2 = pallas_linear_res_ln(attn2, p["out_proj_w"], p["out_proj_b"], x2,
                              p["ln1_g"], p["ln1_b"], out_dtype=cdt)

    # FFN: GELU(lin1) then norm2(x + lin2) fused into the second matmul.
    ff = pallas_linear(x2, p["lin1_w"], p["lin1_b"], activation="gelu")
    x2 = pallas_linear_res_ln(ff, p["lin2_w"], p["lin2_b"], x2,
                              p["ln2_g"], p["ln2_b"], out_dtype=cdt)
    return x2.reshape(B, S, E)


def vit_encoder_forward(params, x, *, patch_size, nhead):
    """params must come from prepare_params (weights already in compute dtype)."""
    cdt = params["patch_w"].dtype
    B = x.shape[0]
    patches = patchify(x, patch_size)                                 # [B,N,P]
    N, P = patches.shape[1], patches.shape[2]
    E = params["patch_w"].shape[1]

    emb = pallas_linear(patches.reshape(B * N, P).astype(cdt),
                        params["patch_w"], params["patch_b"])
    emb = emb.reshape(B, N, E)

    cls = jnp.broadcast_to(params["cls_token"], (B, 1, E))
    h = jnp.concatenate([cls, emb.astype(jnp.float32)], axis=1) + params["pos_embed"]

    # Pad the token axis ONCE to a multiple of 16 (bf16 sublane pack); padded
    # key positions are masked inside the attention kernel, padded rows are
    # otherwise inert and are never read back (cls_out = h[:, 0]).
    S = N + 1
    S_pad = ((S + 15) // 16) * 16
    if S_pad != S:
        h = jnp.pad(h, ((0, 0), (0, S_pad - S), (0, 0)))
    h = h.astype(cdt)                                                 # [B,Sp,E]

    for p in params["layers"]:
        h = encoder_layer(h, p, nhead, s_valid=S, cdt=cdt)

    cls_out = h[:, 0]                                                 # [B, E]
    latent = pallas_linear(cls_out, params["latent_w"], params["latent_b"],
                           out_dtype=jnp.float32)
    return latent

    # TODO(synk): dropout layers (p=0.1) inside nn.TransformerEncoderLayer are
    # implemented as identity (eval-mode semantics).


# ---------------------------------------------------------------------------
# One-time parameter preparation (pre-cast weights, split in_proj per head)
# ---------------------------------------------------------------------------
def prepare_params(params, nhead, compute_dtype=jnp.bfloat16):
    cdt = compute_dtype
    E = params["patch_w"].shape[1]
    Dh = E // nhead

    def split_w(w_block):    # [E, E] -> [nhead, E, Dh]
        return jnp.asarray(w_block).reshape(E, nhead, Dh).transpose(1, 0, 2).astype(cdt)

    def split_b(b_block):    # [E] -> [nhead, 1, Dh]
        return jnp.asarray(b_block).reshape(nhead, 1, Dh).astype(jnp.float32)

    out = {
        "patch_w": params["patch_w"].astype(cdt),
        "patch_b": params["patch_b"].astype(jnp.float32),
        "cls_token": params["cls_token"].astype(jnp.float32),
        "pos_embed": params["pos_embed"].astype(jnp.float32),
        "latent_w": params["latent_w"].astype(cdt),
        "latent_b": params["latent_b"].astype(jnp.float32),
        "layers": [],
    }
    for p in params["layers"]:
        ipw, ipb = p["in_proj_w"], p["in_proj_b"]
        out["layers"].append({
            "wq": split_w(ipw[:, :E]),
            "wk": split_w(ipw[:, E:2 * E]),
            "wv": split_w(ipw[:, 2 * E:]),
            "bq": split_b(ipb[:E]),
            "bk": split_b(ipb[E:2 * E]),
            "bv": split_b(ipb[2 * E:]),
            "out_proj_w": p["out_proj_w"].astype(cdt),
            "out_proj_b": p["out_proj_b"].astype(jnp.float32),
            "ln1_g": p["ln1_g"].astype(jnp.float32),
            "ln1_b": p["ln1_b"].astype(jnp.float32),
            "lin1_w": p["lin1_w"].astype(cdt),
            "lin1_b": p["lin1_b"].astype(jnp.float32),
            "lin2_w": p["lin2_w"].astype(cdt),
            "lin2_b": p["lin2_b"].astype(jnp.float32),
            "ln2_g": p["ln2_g"].astype(jnp.float32),
            "ln2_b": p["ln2_b"].astype(jnp.float32),
        })
    return out


# ---------------------------------------------------------------------------
# Pure-JAX reference (numerical sanity check of the Pallas path)
# ---------------------------------------------------------------------------
def _layernorm_ref(y, g, b, eps=1e-5):
    mu = jnp.mean(y, axis=-1, keepdims=True)
    var = jnp.mean((y - mu) ** 2, axis=-1, keepdims=True)
    return (y - mu) * jax.lax.rsqrt(var + eps) * g + b


def reference_forward(params, x, *, patch_size, nhead):
    B = x.shape[0]
    patches = patchify(x, patch_size)
    emb = patches @ params["patch_w"] + params["patch_b"]
    E = emb.shape[-1]
    cls = jnp.broadcast_to(params["cls_token"], (B, 1, E))
    h = jnp.concatenate([cls, emb], axis=1) + params["pos_embed"]
    S = h.shape[1]
    Dh = E // nhead
    for p in params["layers"]:
        qkv = h @ p["in_proj_w"] + p["in_proj_b"]
        q, k, v = jnp.split(qkv, 3, axis=-1)

        def heads(t):
            return t.reshape(B, S, nhead, Dh).transpose(0, 2, 1, 3)

        qh, kh, vh = heads(q), heads(k), heads(v)
        s = jnp.einsum("bhqd,bhkd->bhqk", qh, kh) / math.sqrt(Dh)
        a = jax.nn.softmax(s, axis=-1)
        o = jnp.einsum("bhqk,bhkd->bhqd", a, vh).transpose(0, 2, 1, 3).reshape(B, S, E)
        o = o @ p["out_proj_w"] + p["out_proj_b"]
        h = _layernorm_ref(h + o, p["ln1_g"], p["ln1_b"])
        f = jax.nn.gelu(h @ p["lin1_w"] + p["lin1_b"], approximate=False)
        f = f @ p["lin2_w"] + p["lin2_b"]
        h = _layernorm_ref(h + f, p["ln2_g"], p["ln2_b"])
    return h[:, 0] @ params["latent_w"] + params["latent_b"]


# ---------------------------------------------------------------------------
# Deterministic synthetic parameters (shapes follow the PyTorch __init__)
# ---------------------------------------------------------------------------
def init_params(key, *, img_size, patch_size, in_chans, embed_dim, depth, nhead,
                mlp_ratio, latent_dim):
    gh, gw = img_size[0] // patch_size[0], img_size[1] // patch_size[1]
    num_patches = gh * gw
    P = in_chans * patch_size[0] * patch_size[1]
    ff = int(embed_dim * mlp_ratio)
    keys = jax.random.split(key, 8 + depth)

    def nrm(k, shape, std):
        return jax.random.normal(k, shape, jnp.float32) * std

    params = {
        # conv weight (E, C, ph, pw) stored pre-flattened/transposed as (C*ph*pw, E)
        "patch_w": nrm(keys[0], (P, embed_dim), 1.0 / math.sqrt(P)),
        "patch_b": jnp.zeros((embed_dim,), jnp.float32),
        "cls_token": nrm(keys[1], (1, 1, embed_dim), 0.02),
        "pos_embed": nrm(keys[2], (1, num_patches + 1, embed_dim), 0.02),
        "latent_w": nrm(keys[3], (embed_dim, latent_dim), 1.0 / math.sqrt(embed_dim)),
        "latent_b": jnp.zeros((latent_dim,), jnp.float32),
        "layers": [],
    }
    for d in range(depth):
        lk = jax.random.split(keys[8 + d], 4)
        params["layers"].append({
            "in_proj_w": nrm(lk[0], (embed_dim, 3 * embed_dim), 1.0 / math.sqrt(embed_dim)),
            "in_proj_b": jnp.zeros((3 * embed_dim,), jnp.float32),
            "out_proj_w": nrm(lk[1], (embed_dim, embed_dim), 1.0 / math.sqrt(embed_dim)),
            "out_proj_b": jnp.zeros((embed_dim,), jnp.float32),
            "ln1_g": jnp.ones((embed_dim,), jnp.float32),
            "ln1_b": jnp.zeros((embed_dim,), jnp.float32),
            "lin1_w": nrm(lk[2], (embed_dim, ff), 1.0 / math.sqrt(embed_dim)),
            "lin1_b": jnp.zeros((ff,), jnp.float32),
            "lin2_w": nrm(lk[3], (ff, embed_dim), 1.0 / math.sqrt(ff)),
            "lin2_b": jnp.zeros((embed_dim,), jnp.float32),
            "ln2_g": jnp.ones((embed_dim,), jnp.float32),
            "ln2_b": jnp.zeros((embed_dim,), jnp.float32),
        })
    return params


# ---------------------------------------------------------------------------
if __name__ == "__main__":
    # Small shapes consistent with the module's forward.
    img_size = (64, 32)
    patch_size = (16, 16)     # grid (4, 2) -> 8 patches, seq = 9 (padded to 16)
    in_chans = 1
    embed_dim = 128           # lane-aligned embed dim; nhead=4 -> Dh=32
    depth = 2
    nhead = 4
    mlp_ratio = 4.0           # FFN width 512
    latent_dim = 256
    B = 2

    key = jax.random.PRNGKey(0)
    pkey, xkey = jax.random.split(key)
    raw_params = init_params(
        pkey, img_size=img_size, patch_size=patch_size, in_chans=in_chans,
        embed_dim=embed_dim, depth=depth, nhead=nhead, mlp_ratio=mlp_ratio,
        latent_dim=latent_dim)

    x = jax.random.normal(xkey, (B, in_chans, img_size[0], img_size[1]), jnp.float32)

    # Pre-cast / pre-split weights ONCE, outside the jitted forward.
    params_bf16 = prepare_params(raw_params, nhead, jnp.bfloat16)
    params_f32 = prepare_params(raw_params, nhead, jnp.float32)

    fwd = jax.jit(functools.partial(vit_encoder_forward,
                                    patch_size=patch_size, nhead=nhead))

    latent_bf16 = jax.block_until_ready(fwd(params_bf16, x))   # performance path
    latent_f32 = jax.block_until_ready(fwd(params_f32, x))     # precision path
    assert latent_bf16.shape == (B, latent_dim), latent_bf16.shape
    assert latent_f32.shape == (B, latent_dim), latent_f32.shape

    # Pure-JAX references.  The "highest" matmul-precision reference is ground
    # truth; the default-precision reference is also checked because backend
    # defaults may decompose f32 MXU matmuls into bf16 passes — the Pallas f32
    # path should closely track one of the two.
    ref_default = reference_forward(raw_params, x, patch_size=patch_size, nhead=nhead)
    with jax.default_matmul_precision("highest"):
        ref_highest = reference_forward(raw_params, x, patch_size=patch_size, nhead=nhead)

    diff_f32 = min(float(jnp.max(jnp.abs(latent_f32 - ref_highest))),
                   float(jnp.max(jnp.abs(latent_f32 - ref_default))))
    diff_bf16 = float(jnp.max(jnp.abs(latent_bf16 - ref_highest)))
    assert diff_f32 < 2e-2, f"f32 Pallas vs reference mismatch: {diff_f32}"
    assert diff_bf16 < 1e-1, f"bf16 Pallas vs reference mismatch: {diff_bf16}"

    print("KERNEL_OK")
</pallas_src>

<mosaic_0001>
module attributes {stable_mosaic.version = 11 : i64} {
  func.func @_linear_kernel(%arg0: i32, %arg1: i32, %arg2: memref<16x256xbf16, #tpu.memory_space<vmem>>, %arg3: memref<256x128xbf16, #tpu.memory_space<vmem>>, %arg4: memref<1x128xf32, #tpu.memory_space<vmem>>, %arg5: memref<16x128xbf16, #tpu.memory_space<vmem>>) attributes {dimension_semantics = [#tpu.dimension_semantics<parallel>, #tpu.dimension_semantics<parallel>], iteration_bounds = array<i64: 1, 1>, scalar_prefetch = 0 : i64, scratch_operands = 0 : i64, tpu.core_type = #tpu.core_type<tc>, window_params = [{transform_indices = @transform_0, window_bounds = array<i64: 16, 256>}, {transform_indices = @transform_1, window_bounds = array<i64: 256, 128>}, {transform_indices = @transform_2, window_bounds = array<i64: 1, 128>}, {transform_indices = @transform_3, window_bounds = array<i64: 16, 128>}]} {
    %c0 = arith.constant 0 : index
    %c0_0 = arith.constant 0 : index
    %0 = vector.load %arg2[%c0, %c0_0] : memref<16x256xbf16, #tpu.memory_space<vmem>>, vector<16x256xbf16>
    %c0_1 = arith.constant 0 : index
    %c0_2 = arith.constant 0 : index
    %1 = vector.load %arg3[%c0_1, %c0_2] : memref<256x128xbf16, #tpu.memory_space<vmem>>, vector<256x128xbf16>
    %cst = arith.constant dense<0.000000e+00> : vector<16x128xf32>
    %2 = tpu.matmul %0, %1, %cst {dimension_numbers = #tpu.dot_dimension_numbers<[1], [0], [0], [1], [0, 0, 1, 1], [], []>} : vector<16x256xbf16>, vector<256x128xbf16>, vector<16x128xf32> -> vector<16x128xf32>
    %c0_3 = arith.constant 0 : index
    %c0_4 = arith.constant 0 : index
    %3 = vector.load %arg4[%c0_3, %c0_4] : memref<1x128xf32, #tpu.memory_space<vmem>>, vector<1x128xf32>
    %4 = vector.broadcast %3 : vector<1x128xf32> to vector<16x128xf32>
    %5 = arith.addf %2, %4 : vector<16x128xf32>
    %6 = arith.truncf %5 : vector<16x128xf32> to vector<16x128xbf16>
    %c0_5 = arith.constant 0 : index
    %c0_6 = arith.constant 0 : index
    %7 = vector.load %arg5[%c0_5, %c0_6] : memref<16x128xbf16, #tpu.memory_space<vmem>>, vector<16x128xbf16>
    tpu.vector_store %arg5[%c0_5, %c0_6], %6 {strides = array<i32>} : memref<16x128xbf16, #tpu.memory_space<vmem>>, vector<16x128xbf16>,
    return
  }
  func.func @transform_0(%arg0: i32, %arg1: i32) -> (i32, i32) {
    %c0_i32 = arith.constant 0 : i32
    %c0_i32_0 = arith.constant 0 : i32
    return %arg0, %c0_i32 : i32, i32
  }
  func.func @transform_1(%arg0: i32, %arg1: i32) -> (i32, i32) {
    %c0_i32 = arith.constant 0 : i32
    %c0_i32_0 = arith.constant 0 : i32
    return %c0_i32, %arg1 : i32, i32
  }
  func.func @transform_2(%arg0: i32, %arg1: i32) -> (i32, i32) {
    %c0_i32 = arith.constant 0 : i32
    %c0_i32_0 = arith.constant 0 : i32
    return %c0_i32, %arg1 : i32, i32
  }
  func.func @transform_3(%arg0: i32, %arg1: i32) -> (i32, i32) {
    %c0_i32 = arith.constant 0 : i32
    return %arg0, %arg1 : i32, i32
  }
}

module attributes {stable_mosaic.version = 11 : i64} {
  func.func @_mhsa_kernel(%arg0: i32, %arg1: i32, %arg2: memref<1x16x128xbf16, #tpu.memory_space<vmem>>, %arg3: memref<1x128x32xbf16, #tpu.memory_space<vmem>>, %arg4: memref<1x128x32xbf16, #tpu.memory_space<vmem>>, %arg5: memref<1x128x32xbf16, #tpu.memory_space<vmem>>, %arg6: memref<1x1x32xf32, #tpu.memory_space<vmem>>, %arg7: memref<1x1x32xf32, #tpu.memory_space<vmem>>, %arg8: memref<1x1x32xf32, #tpu.memory_space<vmem>>, %arg9: memref<1x1x16x32xbf16, #tpu.memory_space<vmem>>) attributes {dimension_semantics = [#tpu.dimension_semantics<parallel>, #tpu.dimension_semantics<parallel>], iteration_bounds = array<i64: 2, 4>, scalar_prefetch = 0 : i64, scratch_operands = 0 : i64, tpu.core_type = #tpu.core_type<tc>, window_params = [{transform_indices = @transform_0, window_bounds = array<i64: 1, 16, 128>}, {transform_indices = @transform_1, window_bounds = array<i64: 1, 128, 32>}, {transform_indices = @transform_2, window_bounds = array<i64: 1, 128, 32>}, {transform_indices = @transform_3, window_bounds = array<i64: 1, 128, 32>}, {transform_indices = @transform_4, window_bounds = array<i64: 1, 1, 32>}, {transform_indices = @transform_5, window_bounds = array<i64: 1, 1, 32>}, {transform_indices = @transform_6, window_bounds = array<i64: 1, 1, 32>}, {transform_indices = @transform_7, window_bounds = array<i64: 1, 1, 16, 32>}]} {
    %c0 = arith.constant 0 : index
    %c0_0 = arith.constant 0 : index
    %c0_1 = arith.constant 0 : index
    %0 = vector.load %arg2[%c0, %c0_0, %c0_1] : memref<1x16x128xbf16, #tpu.memory_space<vmem>>, vector<1x16x128xbf16>
    %1 = vector.shape_cast %0 : vector<1x16x128xbf16> to vector<16x128xbf16>
    %c0_2 = arith.constant 0 : index
    %c0_3 = arith.constant 0 : index
    %c0_4 = arith.constant 0 : index
    %2 = vector.load %arg3[%c0_2, %c0_3, %c0_4] : memref<1x128x32xbf16, #tpu.memory_space<vmem>>, vector<1x128x32xbf16>
    %3 = vector.shape_cast %2 : vector<1x128x32xbf16> to vector<128x32xbf16>
    %cst = arith.constant dense<0.000000e+00> : vector<16x32xf32>
    %4 = tpu.matmul %1, %3, %cst {dimension_numbers = #tpu.dot_dimension_numbers<[1], [0], [0], [1], [0, 0, 1, 1], [], []>} : vector<16x128xbf16>, vector<128x32xbf16>, vector<16x32xf32> -> vector<16x32xf32>
    %c0_5 = arith.constant 0 : index
    %c0_6 = arith.constant 0 : index
    %c0_7 = arith.constant 0 : index
    %5 = vector.load %arg6[%c0_5, %c0_6, %c0_7] : memref<1x1x32xf32, #tpu.memory_space<vmem>>, vector<1x1x32xf32>
    %6 = vector.shape_cast %5 : vector<1x1x32xf32> to vector<1x32xf32>
    %7 = vector.broadcast %6 : vector<1x32xf32> to vector<16x32xf32>
    %8 = arith.addf %4, %7 : vector<16x32xf32>
    %cst_8 = arith.constant 0.176776692 : f32
    %9 = vector.broadcast %cst_8 : f32 to vector<16x32xf32>
    %10 = arith.mulf %8, %9 : vector<16x32xf32>
    %c0_9 = arith.constant 0 : index
    %c0_10 = arith.constant 0 : index
    %c0_11 = arith.constant 0 : index
    %11 = vector.load %arg4[%c0_9, %c0_10, %c0_11] : memref<1x128x32xbf16, #tpu.memory_space<vmem>>, vector<1x128x32xbf16>
    %12 = vector.shape_cast %11 : vector<1x128x32xbf16> to vector<128x32xbf16>
    %cst_12 = arith.constant dense<0.000000e+00> : vector<16x32xf32>
    %13 = tpu.matmul %1, %12, %cst_12 {dimension_numbers = #tpu.dot_dimension_numbers<[1], [0], [0], [1], [0, 0, 1, 1], [], []>} : vector<16x128xbf16>, vector<128x32xbf16>, vector<16x32xf32> -> vector<16x32xf32>
    %c0_13 = arith.constant 0 : index
    %c0_14 = arith.constant 0 : index
    %c0_15 = arith.constant 0 : index
    %14 = vector.load %arg7[%c0_13, %c0_14, %c0_15] : memref<1x1x32xf32, #tpu.memory_space<vmem>>, vector<1x1x32xf32>
    %15 = vector.shape_cast %14 : vector<1x1x32xf32> to vector<1x32xf32>
    %16 = vector.broadcast %15 : vector<1x32xf32> to vector<16x32xf32>
    %17 = arith.addf %13, %16 : vector<16x32xf32>
    %c0_16 = arith.constant 0 : index
    %c0_17 = arith.constant 0 : index
    %c0_18 = arith.constant 0 : index
    %18 = vector.load %arg5[%c0_16, %c0_17, %c0_18] : memref<1x128x32xbf16, #tpu.memory_space<vmem>>, vector<1x128x32xbf16>
    %19 = vector.shape_cast %18 : vector<1x128x32xbf16> to vector<128x32xbf16>
    %cst_19 = arith.constant dense<0.000000e+00> : vector<16x32xf32>
    %20 = tpu.matmul %1, %19, %cst_19 {dimension_numbers = #tpu.dot_dimension_numbers<[1], [0], [0], [1], [0, 0, 1, 1], [], []>} : vector<16x128xbf16>, vector<128x32xbf16>, vector<16x32xf32> -> vector<16x32xf32>
    %c0_20 = arith.constant 0 : index
    %c0_21 = arith.constant 0 : index
    %c0_22 = arith.constant 0 : index
    %21 = vector.load %arg8[%c0_20, %c0_21, %c0_22] : memref<1x1x32xf32, #tpu.memory_space<vmem>>, vector<1x1x32xf32>
    %22 = vector.shape_cast %21 : vector<1x1x32xf32> to vector<1x32xf32>
    %23 = vector.broadcast %22 : vector<1x32xf32> to vector<16x32xf32>
    %24 = arith.addf %20, %23 : vector<16x32xf32>
    %25 = arith.truncf %10 : vector<16x32xf32> to vector<16x32xbf16>
    %26 = arith.truncf %17 : vector<16x32xf32> to vector<16x32xbf16>
    %cst_23 = arith.constant dense<0.000000e+00> : vector<16x16xf32>
    %27 = tpu.matmul %25, %26, %cst_23 {dimension_numbers = #tpu.dot_dimension_numbers<[1], [1], [0], [0], [0, 0, 1, 0], [], []>} : vector<16x32xbf16>, vector<16x32xbf16>, vector<16x16xf32> -> vector<16x16xf32>
    %28 = tpu.iota {dimensions = array<i32: 1>} : vector<16x16xi32>
    %c9_i32 = arith.constant 9 : i32
    %29 = vector.broadcast %c9_i32 : i32 to vector<16x16xi32>
    %30 = arith.cmpi slt, %28, %29 : vector<16x16xi32>
    %cst_24 = arith.constant -1.000000e+30 : f32
    %31 = vector.broadcast %cst_24 : f32 to vector<16x16xf32>
    %32 = arith.select %30, %27, %31 : vector<16x16xi1>, vector<16x16xf32>
    %cst_25 = arith.constant dense<0xFF800000> : vector<16xf32>
    %33 = vector.multi_reduction <maximumf>, %32, %cst_25 [1] : vector<16x16xf32> to vector<16xf32>
    %34 = vector.shape_cast %33 : vector<16xf32> to vector<16x1xf32>
    %35 = vector.broadcast %34 : vector<16x1xf32> to vector<16x16xf32>
    %36 = arith.subf %32, %35 : vector<16x16xf32>
    %37 = math.exp %36 : vector<16x16xf32>
    %cst_26 = arith.constant dense<0.000000e+00> : vector<16xf32>
    %38 = vector.multi_reduction <add>, %37, %cst_26 [1] : vector<16x16xf32> to vector<16xf32>
    %39 = vector.shape_cast %38 : vector<16xf32> to vector<16x1xf32>
    %40 = tpu.reciprocal %39 {approx = true} : vector<16x1xf32> -> vector<16x1xf32>
    %41 = vector.broadcast %40 : vector<16x1xf32> to vector<16x16xf32>
    %42 = arith.mulf %37, %41 : vector<16x16xf32>
    %43 = arith.truncf %42 : vector<16x16xf32> to vector<16x16xbf16>
    %44 = arith.truncf %24 : vector<16x32xf32> to vector<16x32xbf16>
    %cst_27 = arith.constant dense<0.000000e+00> : vector<16x32xf32>
    %45 = tpu.matmul %43, %44, %cst_27 {dimension_numbers = #tpu.dot_dimension_numbers<[1], [0], [0], [1], [0, 0, 1, 1], [], []>} : vector<16x16xbf16>, vector<16x32xbf16>, vector<16x32xf32> -> vector<16x32xf32>
    %46 = arith.truncf %45 : vector<16x32xf32> to vector<16x32xbf16>
    %c0_28 = arith.constant 0 : index
    %c0_29 = arith.constant 0 : index
    %c0_30 = arith.constant 0 : index
    %c0_31 = arith.constant 0 : index
    %47 = vector.load %arg9[%c0_28, %c0_29, %c0_30, %c0_31] : memref<1x1x16x32xbf16, #tpu.memory_space<vmem>>, vector<1x1x16x32xbf16>
    %48 = vector.shape_cast %47 : vector<1x1x16x32xbf16> to vector<16x32xbf16>
    %49 = vector.shape_cast %46 : vector<16x32xbf16> to vector<1x1x16x32xbf16>
    tpu.vector_store %arg9[%c0_28, %c0_29, %c0_30, %c0_31], %49 {strides = array<i32>} : memref<1x1x16x32xbf16, #tpu.memory_space<vmem>>, vector<1x1x16x32xbf16>,
    return
  }
  func.func @transform_0(%arg0: i32, %arg1: i32) -> (i32, i32, i32) {
    %c0_i32 = arith.constant 0 : i32
    %c0_i32_0 = arith.constant 0 : i32
    %c0_i32_1 = arith.constant 0 : i32
    return %arg0, %c0_i32, %c0_i32_0 : i32, i32, i32
  }
  func.func @transform_1(%arg0: i32, %arg1: i32) -> (i32, i32, i32) {
    %c0_i32 = arith.constant 0 : i32
    %c0_i32_0 = arith.constant 0 : i32
    %c0_i32_1 = arith.constant 0 : i32
    return %arg1, %c0_i32, %c0_i32_0 : i32, i32, i32
  }
  func.func @transform_2(%arg0: i32, %arg1: i32) -> (i32, i32, i32) {
    %c0_i32 = arith.constant 0 : i32
    %c0_i32_0 = arith.constant 0 : i32
    %c0_i32_1 = arith.constant 0 : i32
    return %arg1, %c0_i32, %c0_i32_0 : i32, i32, i32
  }
  func.func @transform_3(%arg0: i32, %arg1: i32) -> (i32, i32, i32) {
    %c0_i32 = arith.constant 0 : i32
    %c0_i32_0 = arith.constant 0 : i32
    %c0_i32_1 = arith.constant 0 : i32
    return %arg1, %c0_i32, %c0_i32_0 : i32, i32, i32
  }
  func.func @transform_4(%arg0: i32, %arg1: i32) -> (i32, i32, i32) {
    %c0_i32 = arith.constant 0 : i32
    %c0_i32_0 = arith.constant 0 : i32
    %c0_i32_1 = arith.constant 0 : i32
    return %arg1, %c0_i32, %c0_i32_0 : i32, i32, i32
  }
  func.func @transform_5(%arg0: i32, %arg1: i32) -> (i32, i32, i32) {
    %c0_i32 = arith.constant 0 : i32
    %c0_i32_0 = arith.constant 0 : i32
    %c0_i32_1 = arith.constant 0 : i32
    return %arg1, %c0_i32, %c0_i32_0 : i32, i32, i32
  }
  func.func @transform_6(%arg0: i32, %arg1: i32) -> (i32, i32, i32) {
    %c0_i32 = arith.constant 0 : i32
    %c0_i32_0 = arith.constant 0 : i32
    %c0_i32_1 = arith.constant 0 : i32
    return %arg1, %c0_i32, %c0_i32_0 : i32, i32, i32
  }
  func.func @transform_7(%arg0: i32, %arg1: i32) -> (i32, i32, i32, i32) {
    %c0_i32 = arith.constant 0 : i32
    %c0_i32_0 = arith.constant 0 : i32
    %c0_i32_1 = arith.constant 0 : i32
    return %arg0, %arg1, %c0_i32, %c0_i32_0 : i32, i32, i32, i32
  }
}

module attributes {stable_mosaic.version = 11 : i64} {
  func.func @_linear_res_ln_kernel(%arg0: i32, %arg1: memref<16x128xbf16, #tpu.memory_space<vmem>>, %arg2: memref<128x128xbf16, #tpu.memory_space<vmem>>, %arg3: memref<1x128xf32, #tpu.memory_space<vmem>>, %arg4: memref<16x128xbf16, #tpu.memory_space<vmem>>, %arg5: memref<1x128xf32, #tpu.memory_space<vmem>>, %arg6: memref<1x128xf32, #tpu.memory_space<vmem>>, %arg7: memref<16x128xbf16, #tpu.memory_space<vmem>>) attributes {dimension_semantics = [#tpu.dimension_semantics<parallel>], iteration_bounds = array<i64: 2>, scalar_prefetch = 0 : i64, scratch_operands = 0 : i64, tpu.core_type = #tpu.core_type<tc>, window_params = [{transform_indices = @transform_0, window_bounds = array<i64: 16, 128>}, {pipeline_mode = #tpu.pipeline_mode<synchronous>, transform_indices = @transform_1, window_bounds = array<i64: 128, 128>}, {pipeline_mode = #tpu.pipeline_mode<synchronous>, transform_indices = @transform_2, window_bounds = array<i64: 1, 128>}, {transform_indices = @transform_3, window_bounds = array<i64: 16, 128>}, {pipeline_mode = #tpu.pipeline_mode<synchronous>, transform_indices = @transform_4, window_bounds = array<i64: 1, 128>}, {pipeline_mode = #tpu.pipeline_mode<synchronous>, transform_indices = @transform_5, window_bounds = array<i64: 1, 128>}, {transform_indices = @transform_6, window_bounds = array<i64: 16, 128>}]} {
    %c0 = arith.constant 0 : index
    %c0_0 = arith.constant 0 : index
    %0 = vector.load %arg1[%c0, %c0_0] : memref<16x128xbf16, #tpu.memory_space<vmem>>, vector<16x128xbf16>
    %c0_1 = arith.constant 0 : index
    %c0_2 = arith.constant 0 : index
    %1 = vector.load %arg2[%c0_1, %c0_2] : memref<128x128xbf16, #tpu.memory_space<vmem>>, vector<128x128xbf16>
    %cst = arith.constant dense<0.000000e+00> : vector<16x128xf32>
    %2 = tpu.matmul %0, %1, %cst {dimension_numbers = #tpu.dot_dimension_numbers<[1], [0], [0], [1], [0, 0, 1, 1], [], []>} : vector<16x128xbf16>, vector<128x128xbf16>, vector<16x128xf32> -> vector<16x128xf32>
    %c0_3 = arith.constant 0 : index
    %c0_4 = arith.constant 0 : index
    %3 = vector.load %arg3[%c0_3, %c0_4] : memref<1x128xf32, #tpu.memory_space<vmem>>, vector<1x128xf32>
    %4 = vector.broadcast %3 : vector<1x128xf32> to vector<16x128xf32>
    %5 = arith.addf %2, %4 : vector<16x128xf32>
    %c0_5 = arith.constant 0 : index
    %c0_6 = arith.constant 0 : index
    %6 = vector.load %arg4[%c0_5, %c0_6] : memref<16x128xbf16, #tpu.memory_space<vmem>>, vector<16x128xbf16>
    %7 = arith.extf %6 : vector<16x128xbf16> to vector<16x128xf32>
    %8 = arith.addf %5, %7 : vector<16x128xf32>
    %cst_7 = arith.constant dense<0.000000e+00> : vector<16xf32>
    %9 = vector.multi_reduction <add>, %8, %cst_7 [1] : vector<16x128xf32> to vector<16xf32>
    %10 = vector.shape_cast %9 : vector<16xf32> to vector<16x1xf32>
    %cst_8 = arith.constant 1.280000e+02 : f32
    %11 = vector.broadcast %cst_8 : f32 to vector<16x1xf32>
    %12 = arith.divf %10, %11 : vector<16x1xf32>
    %13 = vector.broadcast %12 : vector<16x1xf32> to vector<16x128xf32>
    %14 = arith.subf %8, %13 : vector<16x128xf32>
    %15 = arith.mulf %14, %14 : vector<16x128xf32>
    %cst_9 = arith.constant dense<0.000000e+00> : vector<16xf32>
    %16 = vector.multi_reduction <add>, %15, %cst_9 [1] : vector<16x128xf32> to vector<16xf32>
    %17 = vector.shape_cast %16 : vector<16xf32> to vector<16x1xf32>
    %cst_10 = arith.constant 1.280000e+02 : f32
    %18 = vector.broadcast %cst_10 : f32 to vector<16x1xf32>
    %19 = arith.divf %17, %18 : vector<16x1xf32>
    %cst_11 = arith.constant 9.99999974E-6 : f32
    %20 = vector.broadcast %cst_11 : f32 to vector<16x1xf32>
    %21 = arith.addf %19, %20 : vector<16x1xf32>
    %22 = math.rsqrt %21 : vector<16x1xf32>
    %23 = vector.broadcast %22 : vector<16x1xf32> to vector<16x128xf32>
    %24 = arith.mulf %14, %23 : vector<16x128xf32>
    %c0_12 = arith.constant 0 : index
    %c0_13 = arith.constant 0 : index
    %25 = vector.load %arg5[%c0_12, %c0_13] : memref<1x128xf32, #tpu.memory_space<vmem>>, vector<1x128xf32>
    %26 = vector.broadcast %25 : vector<1x128xf32> to vector<16x128xf32>
    %27 = arith.mulf %24, %26 : vector<16x128xf32>
    %c0_14 = arith.constant 0 : index
    %c0_15 = arith.constant 0 : index
    %28 = vector.load %arg6[%c0_14, %c0_15] : memref<1x128xf32, #tpu.memory_space<vmem>>, vector<1x128xf32>
    %29 = vector.broadcast %28 : vector<1x128xf32> to vector<16x128xf32>
    %30 = arith.addf %27, %29 : vector<16x128xf32>
    %31 = arith.truncf %30 : vector<16x128xf32> to vector<16x128xbf16>
    %c0_16 = arith.constant 0 : index
    %c0_17 = arith.constant 0 : index
    %32 = vector.load %arg7[%c0_16, %c0_17] : memref<16x128xbf16, #tpu.memory_space<vmem>>, vector<16x128xbf16>
    tpu.vector_store %arg7[%c0_16, %c0_17], %31 {strides = array<i32>} : memref<16x128xbf16, #tpu.memory_space<vmem>>, vector<16x128xbf16>,
    return
  }
  func.func @transform_0(%arg0: i32) -> (i32, i32) {
    %c0_i32 = arith.constant 0 : i32
    %c0_i32_0 = arith.constant 0 : i32
    return %arg0, %c0_i32 : i32, i32
  }
  func.func @transform_1(%arg0: i32) -> (i32, i32) {
    %c0_i32 = arith.constant 0 : i32
    %c0_i32_0 = arith.constant 0 : i32
    %c0_i32_1 = arith.constant 0 : i32
    return %c0_i32, %c0_i32_0 : i32, i32
  }
  func.func @transform_2(%arg0: i32) -> (i32, i32) {
    %c0_i32 = arith.constant 0 : i32
    %c0_i32_0 = arith.constant 0 : i32
    %c0_i32_1 = arith.constant 0 : i32
    return %c0_i32, %c0_i32_0 : i32, i32
  }
  func.func @transform_3(%arg0: i32) -> (i32, i32) {
    %c0_i32 = arith.constant 0 : i32
    %c0_i32_0 = arith.constant 0 : i32
    return %arg0, %c0_i32 : i32, i32
  }
  func.func @transform_4(%arg0: i32) -> (i32, i32) {
    %c0_i32 = arith.constant 0 : i32
    %c0_i32_0 = arith.constant 0 : i32
    %c0_i32_1 = arith.constant 0 : i32
    return %c0_i32, %c0_i32_0 : i32, i32
  }
  func.func @transform_5(%arg0: i32) -> (i32, i32) {
    %c0_i32 = arith.constant 0 : i32
    %c0_i32_0 = arith.constant 0 : i32
    %c0_i32_1 = arith.constant 0 : i32
    return %c0_i32, %c0_i32_0 : i32, i32
  }
  func.func @transform_6(%arg0: i32) -> (i32, i32) {
    %c0_i32 = arith.constant 0 : i32
    %c0_i32_0 = arith.constant 0 : i32
    return %arg0, %c0_i32 : i32, i32
  }
}

module attributes {stable_mosaic.version = 11 : i64} {
  func.func @_linear_kernel(%arg0: i32, %arg1: i32, %arg2: memref<16x128xbf16, #tpu.memory_space<vmem>>, %arg3: memref<128x512xbf16, #tpu.memory_space<vmem>>, %arg4: memref<1x512xf32, #tpu.memory_space<vmem>>, %arg5: memref<16x512xbf16, #tpu.memory_space<vmem>>) attributes {dimension_semantics = [#tpu.dimension_semantics<parallel>, #tpu.dimension_semantics<parallel>], iteration_bounds = array<i64: 2, 1>, scalar_prefetch = 0 : i64, scratch_operands = 0 : i64, tpu.core_type = #tpu.core_type<tc>, window_params = [{transform_indices = @transform_0, window_bounds = array<i64: 16, 128>}, {transform_indices = @transform_1, window_bounds = array<i64: 128, 512>}, {transform_indices = @transform_2, window_bounds = array<i64: 1, 512>}, {transform_indices = @transform_3, window_bounds = array<i64: 16, 512>}]} {
    %c0 = arith.constant 0 : index
    %c0_0 = arith.constant 0 : index
    %0 = vector.load %arg2[%c0, %c0_0] : memref<16x128xbf16, #tpu.memory_space<vmem>>, vector<16x128xbf16>
    %c0_1 = arith.constant 0 : index
    %c0_2 = arith.constant 0 : index
    %1 = vector.load %arg3[%c0_1, %c0_2] : memref<128x512xbf16, #tpu.memory_space<vmem>>, vector<128x512xbf16>
    %cst = arith.constant dense<0.000000e+00> : vector<16x512xf32>
    %2 = tpu.matmul %0, %1, %cst {dimension_numbers = #tpu.dot_dimension_numbers<[1], [0], [0], [1], [0, 0, 1, 1], [], []>} : vector<16x128xbf16>, vector<128x512xbf16>, vector<16x512xf32> -> vector<16x512xf32>
    %c0_3 = arith.constant 0 : index
    %c0_4 = arith.constant 0 : index
    %3 = vector.load %arg4[%c0_3, %c0_4] : memref<1x512xf32, #tpu.memory_space<vmem>>, vector<1x512xf32>
    %4 = vector.broadcast %3 : vector<1x512xf32> to vector<16x512xf32>
    %5 = arith.addf %2, %4 : vector<16x512xf32>
    %cst_5 = arith.constant 5.000000e-01 : f32
    %6 = vector.broadcast %cst_5 : f32 to vector<16x512xf32>
    %7 = arith.mulf %6, %5 : vector<16x512xf32>
    %cst_6 = arith.constant 0.707106769 : f32
    %8 = vector.broadcast %cst_6 : f32 to vector<16x512xf32>
    %9 = arith.mulf %5, %8 : vector<16x512xf32>
    %10 = math.absf %9 : vector<16x512xf32>
    %cst_7 = arith.constant 0.327591091 : f32
    %11 = vector.broadcast %cst_7 : f32 to vector<16x512xf32>
    %12 = arith.mulf %11, %10 : vector<16x512xf32>
    %cst_8 = arith.constant 1.000000e+00 : f32
    %13 = vector.broadcast %cst_8 : f32 to vector<16x512xf32>
    %14 = arith.addf %13, %12 : vector<16x512xf32>
    %cst_9 = arith.constant 1.000000e+00 : f32
    %15 = vector.broadcast %cst_9 : f32 to vector<16x512xf32>
    %16 = arith.divf %15, %14 : vector<16x512xf32>
    %cst_10 = arith.constant 1.06140542 : f32
    %17 = vector.broadcast %cst_10 : f32 to vector<16x512xf32>
    %18 = arith.mulf %17, %16 : vector<16x512xf32>
    %cst_11 = arith.constant -1.45315206 : f32
    %19 = vector.broadcast %cst_11 : f32 to vector<16x512xf32>
    %20 = arith.addf %18, %19 : vector<16x512xf32>
    %21 = arith.mulf %20, %16 : vector<16x512xf32>
    %cst_12 = arith.constant 1.42141378 : f32
    %22 = vector.broadcast %cst_12 : f32 to vector<16x512xf32>
    %23 = arith.addf %21, %22 : vector<16x512xf32>
    %24 = arith.mulf %23, %16 : vector<16x512xf32>
    %cst_13 = arith.constant -0.284496725 : f32
    %25 = vector.broadcast %cst_13 : f32 to vector<16x512xf32>
    %26 = arith.addf %24, %25 : vector<16x512xf32>
    %27 = arith.mulf %26, %16 : vector<16x512xf32>
    %cst_14 = arith.constant 0.254829586 : f32
    %28 = vector.broadcast %cst_14 : f32 to vector<16x512xf32>
    %29 = arith.addf %27, %28 : vector<16x512xf32>
    %30 = arith.mulf %29, %16 : vector<16x512xf32>
    %cst_15 = arith.constant 0.000000e+00 : f32
    %31 = vector.broadcast %cst_15 : f32 to vector<16x512xf32>
    %32 = arith.subf %31, %10 : vector<16x512xf32>
    %33 = arith.mulf %32, %10 : vector<16x512xf32>
    %34 = math.exp %33 : vector<16x512xf32>
    %35 = arith.mulf %30, %34 : vector<16x512xf32>
    %cst_16 = arith.constant 1.000000e+00 : f32
    %36 = vector.broadcast %cst_16 : f32 to vector<16x512xf32>
    %37 = arith.subf %36, %35 : vector<16x512xf32>
    %cst_17 = arith.constant 0.000000e+00 : f32
    %38 = vector.broadcast %cst_17 : f32 to vector<16x512xf32>
    %39 = arith.cmpf oge, %9, %38 : vector<16x512xf32>
    %cst_18 = arith.constant 0.000000e+00 : f32
    %40 = vector.broadcast %cst_18 : f32 to vector<16x512xf32>
    %41 = arith.subf %40, %37 : vector<16x512xf32>
    %42 = arith.select %39, %37, %41 : vector<16x512xi1>, vector<16x512xf32>
    %cst_19 = arith.constant 1.000000e+00 : f32
    %43 = vector.broadcast %cst_19 : f32 to vector<16x512xf32>
    %44 = arith.addf %43, %42 : vector<16x512xf32>
    %45 = arith.mulf %7, %44 : vector<16x512xf32>
    %46 = arith.truncf %45 : vector<16x512xf32> to vector<16x512xbf16>
    %c0_20 = arith.constant 0 : index
    %c0_21 = arith.constant 0 : index
    %47 = vector.load %arg5[%c0_20, %c0_21] : memref<16x512xbf16, #tpu.memory_space<vmem>>, vector<16x512xbf16>
    tpu.vector_store %arg5[%c0_20, %c0_21], %46 {strides = array<i32>} : memref<16x512xbf16, #tpu.memory_space<vmem>>, vector<16x512xbf16>,
    return
  }
  func.func @transform_0(%arg0: i32, %arg1: i32) -> (i32, i32) {
    %c0_i32 = arith.constant 0 : i32
    %c0_i32_0 = arith.constant 0 : i32
    return %arg0, %c0_i32 : i32, i32
  }
  func.func @transform_1(%arg0: i32, %arg1: i32) -> (i32, i32) {
    %c0_i32 = arith.constant 0 : i32
    %c0_i32_0 = arith.constant 0 : i32
    return %c0_i32, %arg1 : i32, i32
  }
  func.func @transform_2(%arg0: i32, %arg1: i32) -> (i32, i32) {
    %c0_i32 = arith.constant 0 : i32
    %c0_i32_0 = arith.constant 0 : i32
    return %c0_i32, %arg1 : i32, i32
  }
  func.func @transform_3(%arg0: i32, %arg1: i32) -> (i32, i32) {
    %c0_i32 = arith.constant 0 : i32
    return %arg0, %arg1 : i32, i32
  }
}

module attributes {stable_mosaic.version = 11 : i64} {
  func.func @_linear_res_ln_kernel(%arg0: i32, %arg1: memref<16x512xbf16, #tpu.memory_space<vmem>>, %arg2: memref<512x128xbf16, #tpu.memory_space<vmem>>, %arg3: memref<1x128xf32, #tpu.memory_space<vmem>>, %arg4: memref<16x128xbf16, #tpu.memory_space<vmem>>, %arg5: memref<1x128xf32, #tpu.memory_space<vmem>>, %arg6: memref<1x128xf32, #tpu.memory_space<vmem>>, %arg7: memref<16x128xbf16, #tpu.memory_space<vmem>>) attributes {dimension_semantics = [#tpu.dimension_semantics<parallel>], iteration_bounds = array<i64: 2>, scalar_prefetch = 0 : i64, scratch_operands = 0 : i64, tpu.core_type = #tpu.core_type<tc>, window_params = [{transform_indices = @transform_0, window_bounds = array<i64: 16, 512>}, {pipeline_mode = #tpu.pipeline_mode<synchronous>, transform_indices = @transform_1, window_bounds = array<i64: 512, 128>}, {pipeline_mode = #tpu.pipeline_mode<synchronous>, transform_indices = @transform_2, window_bounds = array<i64: 1, 128>}, {transform_indices = @transform_3, window_bounds = array<i64: 16, 128>}, {pipeline_mode = #tpu.pipeline_mode<synchronous>, transform_indices = @transform_4, window_bounds = array<i64: 1, 128>}, {pipeline_mode = #tpu.pipeline_mode<synchronous>, transform_indices = @transform_5, window_bounds = array<i64: 1, 128>}, {transform_indices = @transform_6, window_bounds = array<i64: 16, 128>}]} {
    %c0 = arith.constant 0 : index
    %c0_0 = arith.constant 0 : index
    %0 = vector.load %arg1[%c0, %c0_0] : memref<16x512xbf16, #tpu.memory_space<vmem>>, vector<16x512xbf16>
    %c0_1 = arith.constant 0 : index
    %c0_2 = arith.constant 0 : index
    %1 = vector.load %arg2[%c0_1, %c0_2] : memref<512x128xbf16, #tpu.memory_space<vmem>>, vector<512x128xbf16>
    %cst = arith.constant dense<0.000000e+00> : vector<16x128xf32>
    %2 = tpu.matmul %0, %1, %cst {dimension_numbers = #tpu.dot_dimension_numbers<[1], [0], [0], [1], [0, 0, 1, 1], [], []>} : vector<16x512xbf16>, vector<512x128xbf16>, vector<16x128xf32> -> vector<16x128xf32>
    %c0_3 = arith.constant 0 : index
    %c0_4 = arith.constant 0 : index
    %3 = vector.load %arg3[%c0_3, %c0_4] : memref<1x128xf32, #tpu.memory_space<vmem>>, vector<1x128xf32>
    %4 = vector.broadcast %3 : vector<1x128xf32> to vector<16x128xf32>
    %5 = arith.addf %2, %4 : vector<16x128xf32>
    %c0_5 = arith.constant 0 : index
    %c0_6 = arith.constant 0 : index
    %6 = vector.load %arg4[%c0_5, %c0_6] : memref<16x128xbf16, #tpu.memory_space<vmem>>, vector<16x128xbf16>
    %7 = arith.extf %6 : vector<16x128xbf16> to vector<16x128xf32>
    %8 = arith.addf %5, %7 : vector<16x128xf32>
    %cst_7 = arith.constant dense<0.000000e+00> : vector<16xf32>
    %9 = vector.multi_reduction <add>, %8, %cst_7 [1] : vector<16x128xf32> to vector<16xf32>
    %10 = vector.shape_cast %9 : vector<16xf32> to vector<16x1xf32>
    %cst_8 = arith.constant 1.280000e+02 : f32
    %11 = vector.broadcast %cst_8 : f32 to vector<16x1xf32>
    %12 = arith.divf %10, %11 : vector<16x1xf32>
    %13 = vector.broadcast %12 : vector<16x1xf32> to vector<16x128xf32>
    %14 = arith.subf %8, %13 : vector<16x128xf32>
    %15 = arith.mulf %14, %14 : vector<16x128xf32>
    %cst_9 = arith.constant dense<0.000000e+00> : vector<16xf32>
    %16 = vector.multi_reduction <add>, %15, %cst_9 [1] : vector<16x128xf32> to vector<16xf32>
    %17 = vector.shape_cast %16 : vector<16xf32> to vector<16x1xf32>
    %cst_10 = arith.constant 1.280000e+02 : f32
    %18 = vector.broadcast %cst_10 : f32 to vector<16x1xf32>
    %19 = arith.divf %17, %18 : vector<16x1xf32>
    %cst_11 = arith.constant 9.99999974E-6 : f32
    %20 = vector.broadcast %cst_11 : f32 to vector<16x1xf32>
    %21 = arith.addf %19, %20 : vector<16x1xf32>
    %22 = math.rsqrt %21 : vector<16x1xf32>
    %23 = vector.broadcast %22 : vector<16x1xf32> to vector<16x128xf32>
    %24 = arith.mulf %14, %23 : vector<16x128xf32>
    %c0_12 = arith.constant 0 : index
    %c0_13 = arith.constant 0 : index
    %25 = vector.load %arg5[%c0_12, %c0_13] : memref<1x128xf32, #tpu.memory_space<vmem>>, vector<1x128xf32>
    %26 = vector.broadcast %25 : vector<1x128xf32> to vector<16x128xf32>
    %27 = arith.mulf %24, %26 : vector<16x128xf32>
    %c0_14 = arith.constant 0 : index
    %c0_15 = arith.constant 0 : index
    %28 = vector.load %arg6[%c0_14, %c0_15] : memref<1x128xf32, #tpu.memory_space<vmem>>, vector<1x128xf32>
    %29 = vector.broadcast %28 : vector<1x128xf32> to vector<16x128xf32>
    %30 = arith.addf %27, %29 : vector<16x128xf32>
    %31 = arith.truncf %30 : vector<16x128xf32> to vector<16x128xbf16>
    %c0_16 = arith.constant 0 : index
    %c0_17 = arith.constant 0 : index
    %32 = vector.load %arg7[%c0_16, %c0_17] : memref<16x128xbf16, #tpu.memory_space<vmem>>, vector<16x128xbf16>
    tpu.vector_store %arg7[%c0_16, %c0_17], %31 {strides = array<i32>} : memref<16x128xbf16, #tpu.memory_space<vmem>>, vector<16x128xbf16>,
    return
  }
  func.func @transform_0(%arg0: i32) -> (i32, i32) {
    %c0_i32 = arith.constant 0 : i32
    %c0_i32_0 = arith.constant 0 : i32
    return %arg0, %c0_i32 : i32, i32
  }
  func.func @transform_1(%arg0: i32) -> (i32, i32) {
    %c0_i32 = arith.constant 0 : i32
    %c0_i32_0 = arith.constant 0 : i32
    %c0_i32_1 = arith.constant 0 : i32
    return %c0_i32, %c0_i32_0 : i32, i32
  }
  func.func @transform_2(%arg0: i32) -> (i32, i32) {
    %c0_i32 = arith.constant 0 : i32
    %c0_i32_0 = arith.constant 0 : i32
    %c0_i32_1 = arith.constant 0 : i32
    return %c0_i32, %c0_i32_0 : i32, i32
  }
  func.func @transform_3(%arg0: i32) -> (i32, i32) {
    %c0_i32 = arith.constant 0 : i32
    %c0_i32_0 = arith.constant 0 : i32
    return %arg0, %c0_i32 : i32, i32
  }
  func.func @transform_4(%arg0: i32) -> (i32, i32) {
    %c0_i32 = arith.constant 0 : i32
    %c0_i32_0 = arith.constant 0 : i32
    %c0_i32_1 = arith.constant 0 : i32
    return %c0_i32, %c0_i32_0 : i32, i32
  }
  func.func @transform_5(%arg0: i32) -> (i32, i32) {
    %c0_i32 = arith.constant 0 : i32
    %c0_i32_0 = arith.constant 0 : i32
    %c0_i32_1 = arith.constant 0 : i32
    return %c0_i32, %c0_i32_0 : i32, i32
  }
  func.func @transform_6(%arg0: i32) -> (i32, i32) {
    %c0_i32 = arith.constant 0 : i32
    %c0_i32_0 = arith.constant 0 : i32
    return %arg0, %c0_i32 : i32, i32
  }
}

module attributes {stable_mosaic.version = 11 : i64} {
  func.func @_linear_kernel(%arg0: i32, %arg1: i32, %arg2: memref<2x128xbf16, #tpu.memory_space<vmem>>, %arg3: memref<128x256xbf16, #tpu.memory_space<vmem>>, %arg4: memref<1x256xf32, #tpu.memory_space<vmem>>, %arg5: memref<2x256xf32, #tpu.memory_space<vmem>>) attributes {dimension_semantics = [#tpu.dimension_semantics<parallel>, #tpu.dimension_semantics<parallel>], iteration_bounds = array<i64: 1, 1>, scalar_prefetch = 0 : i64, scratch_operands = 0 : i64, tpu.core_type = #tpu.core_type<tc>, window_params = [{transform_indices = @transform_0, window_bounds = array<i64: 2, 128>}, {transform_indices = @transform_1, window_bounds = array<i64: 128, 256>}, {transform_indices = @transform_2, window_bounds = array<i64: 1, 256>}, {transform_indices = @transform_3, window_bounds = array<i64: 2, 256>}]} {
    %c0 = arith.constant 0 : index
    %c0_0 = arith.constant 0 : index
    %0 = vector.load %arg2[%c0, %c0_0] : memref<2x128xbf16, #tpu.memory_space<vmem>>, vector<2x128xbf16>
    %c0_1 = arith.constant 0 : index
    %c0_2 = arith.constant 0 : index
    %1 = vector.load %arg3[%c0_1, %c0_2] : memref<128x256xbf16, #tpu.memory_space<vmem>>, vector<128x256xbf16>
    %cst = arith.constant dense<0.000000e+00> : vector<2x256xf32>
    %2 = tpu.matmul %0, %1, %cst {dimension_numbers = #tpu.dot_dimension_numbers<[1], [0], [0], [1], [0, 0, 1, 1], [], []>} : vector<2x128xbf16>, vector<128x256xbf16>, vector<2x256xf32> -> vector<2x256xf32>
    %c0_3 = arith.constant 0 : index
    %c0_4 = arith.constant 0 : index
    %3 = vector.load %arg4[%c0_3, %c0_4] : memref<1x256xf32, #tpu.memory_space<vmem>>, vector<1x256xf32>
    %4 = vector.broadcast %3 : vector<1x256xf32> to vector<2x256xf32>
    %5 = arith.addf %2, %4 : vector<2x256xf32>
    %c0_5 = arith.constant 0 : index
    %c0_6 = arith.constant 0 : index
    %6 = vector.load %arg5[%c0_5, %c0_6] : memref<2x256xf32, #tpu.memory_space<vmem>>, vector<2x256xf32>
    tpu.vector_store %arg5[%c0_5, %c0_6], %5 {strides = array<i32>} : memref<2x256xf32, #tpu.memory_space<vmem>>, vector<2x256xf32>,
    return
  }
  func.func @transform_0(%arg0: i32, %arg1: i32) -> (i32, i32) {
    %c0_i32 = arith.constant 0 : i32
    %c0_i32_0 = arith.constant 0 : i32
    return %arg0, %c0_i32 : i32, i32
  }
  func.func @transform_1(%arg0: i32, %arg1: i32) -> (i32, i32) {
    %c0_i32 = arith.constant 0 : i32
    %c0_i32_0 = arith.constant 0 : i32
    return %c0_i32, %arg1 : i32, i32
  }
  func.func @transform_2(%arg0: i32, %arg1: i32) -> (i32, i32) {
    %c0_i32 = arith.constant 0 : i32
    %c0_i32_0 = arith.constant 0 : i32
    return %c0_i32, %arg1 : i32, i32
  }
  func.func @transform_3(%arg0: i32, %arg1: i32) -> (i32, i32) {
    %c0_i32 = arith.constant 0 : i32
    return %arg0, %arg1 : i32, i32
  }
}

</mosaic_0001>

<bundles_post_ra>
// kernel: vit_encoder_forward.10
= control target key start
LH: loop header
LB: loop body
LE: loop exit
PB: predicated region body
PF: predicated region fallthrough
CT: control target
= control target key end

     0   :  { %s366_s1 = inlined_call_operand.vmem [shape: bf16[256,128], index: 1, kind: input, shape index: {}]   ;;  %s367_s0 = inlined_call_operand.vmem [shape: bf16[16,256], index: 0, kind: input, shape index: {}]   ;;  %s368_s2 = inlined_call_operand.vmem [shape: f32[1,128], index: 2, kind: input, shape index: {}]   ;;  %s369_s3 = inlined_call_operand.vmem [shape: bf16[16,128], index: 3, kind: output, shape index: {}]  }
   0x1   :  { %v267_v0 = vld [vmem:[%s366_s1 + $0x78] sm:$0xff]   ;;  %v269_v2 = vld [vmem:[%s366_s1 + $0x70] sm:$0xff]   ;;  %v271_v4 = vld [vmem:[%s366_s1 + $0x68] sm:$0xff]  }
   0x2   :  { %v268_v1 = vld [vmem:[%s366_s1 + $0x38] sm:$0xff]   ;;  %245 = vmatprep.subr.bf16.mxu0 %v267_v0  ;;  %v270_v3 = vld [vmem:[%s366_s1 + $0x30] sm:$0xff]   ;;  %v272_v5 = vld [vmem:[%s366_s1 + $0x28] sm:$0xff]  }
   0x3   :  { %246 = vmatpush3.bf16.msra.mxu0 %v268_v1  ;;  %v273_v6 = vld [vmem:[%s366_s1 + $0x60] sm:$0xff]   ;;  %v275_v8 = vld [vmem:[%s366_s1 + $0x58] sm:$0xff]   ;;  %v277_v10 = vld [vmem:[%s366_s1 + $0x50] sm:$0xff]  }
   0x4   :  { %247 = vmatprep.subr.bf16.mxu0 %v269_v2  ;;  %v274_v7 = vld [vmem:[%s366_s1 + $0x20] sm:$0xff]   ;;  %v276_v9 = vld [vmem:[%s366_s1 + $0x18] sm:$0xff]   ;;  %v278_v12 = vld [vmem:[%s366_s1 + $0x10] sm:$0xff]  }
   0x5   :  { %v285_v11 = vld [vmem:[%s367_s0 + $0x4] ss:$8 sps:$4 sm:$0xff]   ;;  %v283_v17 = vld [vmem:[%s367_s0] ss:$8 sps:$4 sm:$0xff]  }
   0x6   :  { %194 = vmatprep.mubr.bf16.mxu0 %v285_v11  ;;  %v279_v13 = vld [vmem:[%s366_s1 + $0x48] sm:$0xff]   ;;  %v281_v15 = vld [vmem:[%s366_s1 + $0x40] sm:$0xff]  }
   0x7   :  { %248 = vmatpush3.bf16.msra.mxu0 %v270_v3  ;;  %v280_v14 = vld [vmem:[%s366_s1 + $0x8] sm:$0xff]   ;;  %v282_v16 = vld [vmem:[%s366_s1] sm:$0xff]  }
   0x8   :  { %249 = vmatprep.subr.bf16.mxu0 %v271_v4  ;;  %v217_v22 = vld [vmem:[%s368_s2] ss:$0 sm:$0xff] }
   0xb   :  { %250 = vmatpush3.bf16.msra.mxu0 %v272_v5 }
   0xc   :  { %251 = vmatprep.subr.bf16.mxu0 %v273_v6 }
   0xf   :  { %252 = vmatpush3.bf16.msra.mxu0 %v274_v7 }
  0x10   :  { %253 = vmatprep.subr.bf16.mxu0 %v275_v8 }
  0x13   :  { %254 = vmatpush3.bf16.msra.mxu0 %v276_v9 }
  0x14   :  { %255 = vmatprep.subr.bf16.mxu0 %v277_v10 }
  0x17   :  { %256 = vmatpush3.bf16.msra.mxu0 %v278_v12 }
  0x18   :  { %257 = vmatprep.subr.bf16.mxu0 %v279_v13 }
  0x1b   :  { %258 = vmatpush3.bf16.msra.mxu0 %v280_v14 }
  0x1c   :  { %259 = vmatprep.subr.bf16.mxu0 %v281_v15 }
  0x1f   :  { %260 = vmatpush3.bf16.msra.mxu0 %v282_v16 }
  0x22   :  { %195 = vmatmul.mubr.bf16.vlgmr.msra.gmra.mxu0 %v283_v17 }
  0xe2   :  { %v261_v18 = vpop.f32.mrf.mxu0 }
  0xe4   :  { %v262_v19 = vpop.f32.mrf.mxu0 }
  0xe5   :  { %v263_v21 = vadd.f32 %v262_v19, %v261_v18 }
  0xe6   :  { %v264_v20 = vpop.f32.mrf.mxu0 }
  0xe7   :  { %v197_v25 = vadd.f32 %v263_v21, %v217_v22 }
  0xe8   :  { %v265_v23 = vpop.f32.mrf.mxu0 }
  0xe9   :  { %v266_v24 = vadd.f32 %v265_v23, %v264_v20 }
  0xeb   :  { %v200_v26 = vadd.f32 %v266_v24, %v217_v22 }
  0xed   :  { %v243_v27 = vpack.c.bf16 %v200_v26, %v197_v25 }
  0xef   :  { %244 = vst [vmem:[%s369_s3] sm:$0xff] %v243_v27  }

// kernel: vit_encoder_forward.11
= control target key start
LH: loop header
LB: loop body
LE: loop exit
PB: predicated region body
PF: predicated region fallthrough
CT: control target
= control target key end

     0   :  { %s1350_s24 = smov 0   ;;  %s1352_s25 = smov 0   ;;  %s1513_s0 = inlined_call_operand.vmem [shape: bf16[2,16,128], index: 0, kind: input, shape index: {}]   ;;  %s1514_s1 = inlined_call_operand.vmem [shape: bf16[4,128,32], index: 1, kind: input, shape index: {}]   ;;  %s1515_s2 = inlined_call_operand.vmem [shape: bf16[4,128,32], index: 2, kind: input, shape index: {}]   ;;  %s1516_s3 = inlined_call_operand.vmem [shape: bf16[4,128,32], index: 3, kind: input, shape index: {}]   ;;  %s1517_s4 = inlined_call_operand.vmem [shape: f32[4,1,32], index: 4, kind: input, shape index: {}]   ;;  %s1518_s5 = inlined_call_operand.vmem [shape: f32[4,1,32], index: 5, kind: input, shape index: {}]   ;;  %s1519_s6 = inlined_call_operand.vmem [shape: f32[4,1,32], index: 6, kind: input, shape index: {}]   ;;  %s1520_s7 = inlined_call_operand.vmem [shape: bf16[2,4,16,32], index: 7, kind: output, shape index: {}]  }
   0x1   :  { %s1354_s26 = smov 0   ;;  %s1356_s27 = smov 0  }
   0x2   :  { %s1358_s28 = smov 0  }
   0x3 LB: > { %s26_s29 = sadd.s32 1, %s1298_s26  ;;  %s29_s30 = sadd.s32 1, %s1302_s27  ;;  %s1306_s28 = sphi %s1358_s28, %s17_s28   ;;  %s1302_s27 = sphi %s1356_s27, %s1524_s27   ;;  %s1298_s26 = sphi %s1354_s26, %s1523_s26   ;;  %s1294_s25 = sphi %s1352_s25, %s1522_s25   ;;  %s1290_s24 = sphi %s1350_s24, %s1521_s24  }
   0x4   : > { %p27_p0 = scmp.ge.s32.totalorder %s26_s29, 4  ;;  %p1038_p1 = scmp.ge.s32.totalorder %s1306_s28, 1 }
   0x5   : > { %p305_p2 = scmp.lt.s32.totalorder %s1306_s28, 9 }
   0x6   : > { %s1526_s29 = smov (%p27_p0, %s26_s29), 0  ;;  %s1528_s30 = smov (!%p27_p0, %s29_s30), %s1302_s27 }
   0x7   : > { %p306_p3 = pnand %p1038_p1, %p305_p2  ;;  %p31_p4 = scmp.ge.s32.totalorder %s1528_s30, 2 }
   0x8   : > { %p370_p5 = scmp.lt.s32.totalorder (!%p306_p3), %s1290_s24, 3  ;;  %p365_p6 = scmp.lt.s32.totalorder (!%p306_p3), %s1294_s25, 1 }
   0x9   : > { %s1530_s30 = smov (%p31_p4, %s1528_s30), 0  ;;  %309 = sbr.rel (%p306_p3) target bundleno = 970 (0x3ca), region = 48 }
   0xe   : > { %v1308_v0 = vmov 0.0   ;;  %s1532_s24 = smov (!%p370_p5, %s1290_s24), 3  ;;  %vm1309_vm0 = vmmov 0   ;;  %s1534_s25 = smov (!%p365_p6, %s1294_s25), 1  ;;  %vm752_vm1 = vcmask 261120   ;;  %v800_v45 = vlaneseq }
   0xf   : > { %1141 = vmatprep.subr.bf16.mxu1 %v1308_v0  ;;  %1121 = vmatprep.subr.bf16.mxu0 %v1308_v0  ;;  %s1391_s8 = sshll.u32 %s1532_s24, 6  ;;  %s1084_s15 = sshll.u32 %s1534_s25, 3  ;;  %vm805_vm3 = vcmask 130048   ;;  %vm882_vm4 = vcmask 257024  }
  0x10   : > { %1157 = vmatprep.mubr.msk.bf16.mxu1 %vm1309_vm0, %v1308_v0  ;;  %1137 = vmatprep.mubr.msk.bf16.mxu0 %vm1309_vm0, %v1308_v0  ;;  %s1397_s11 = scalar_lea.vmem %s1515_s2, %s1391_s8  ;;  %s1404_s14 = scalar_lea.vmem %s1514_s1, %s1391_s8  ;;  %v801_v46 = vand.u32 127, %v800_v45 }
  0x11   : > { %v1235_v1 = vld [vmem:[%s1397_s11 + $0x38] sm:$0xff]   ;;  %v1237_v3 = vld [vmem:[%s1397_s11 + $0x30] sm:$0xff]   ;;  %v1239_v5 = vld [vmem:[%s1397_s11 + $0x28] sm:$0xff]   ;;  %s369_s18 = scalar_lea.vmem %s1513_s0, %s1084_s15  ;;  %s1436_s21 = scalar_lea.vmem %s1516_s3, %s1391_s8 }
  0x12   : > { %v1236_v2 = vld [vmem:[%s1404_s14 + $0x38] sm:$0xff]   ;;  %1142 = vmatpush3.bf16.msra.mxu1 %v1235_v1  ;;  %v1238_v4 = vld [vmem:[%s1404_s14 + $0x30] sm:$0xff]   ;;  %v1240_v6 = vld [vmem:[%s1404_s14 + $0x28] sm:$0xff]   ;;  %s390_s8 = scalar_lea.vmem %s1518_s5, %s1532_s24  ;;  %vm802_vm2 = vcmp.lt.s32.totalorder %v801_v46, 9  ;;  %s1047_s16 = sshll.u32 %s1532_s24, 1 }
  0x13   : > { %1122 = vmatpush3.bf16.msra.mxu0 %v1236_v2  ;;  %1143 = vmatprep.subr.bf16.mxu1 %v1308_v0  ;;  %v1241_v7 = vld [vmem:[%s1397_s11 + $0x20] sm:$0xff]   ;;  %v1243_v9 = vld [vmem:[%s1397_s11 + $0x18] sm:$0xff]   ;;  %v1245_v11 = vld [vmem:[%s1397_s11 + $0x10] sm:$0xff]   ;;  %s400_s17 = sadd.s32 %s1084_s15, %s1047_s16 }
  0x14   : > { %1123 = vmatprep.subr.bf16.mxu0 %v1308_v0  ;;  %v1242_v8 = vld [vmem:[%s1404_s14 + $0x20] sm:$0xff]   ;;  %v1244_v10 = vld [vmem:[%s1404_s14 + $0x18] sm:$0xff]   ;;  %v1246_v12 = vld [vmem:[%s1404_s14 + $0x10] sm:$0xff]  }
  0x15   : > { %v1247_v13 = vld [vmem:[%s1397_s11 + $0x8] sm:$0xff]   ;;  %v1249_v15 = vld [vmem:[%s1397_s11] sm:$0xff]   ;;  %s387_s11 = scalar_lea.vmem %s1517_s4, %s1532_s24  ;;  %v1252_v37 = vld [vmem:[%s1436_s21 + $0x38] sm:$0xff]  }
  0x16   : > { %1144 = vmatpush3.bf16.msra.mxu1 %v1237_v3  ;;  %v1248_v14 = vld [vmem:[%s1404_s14 + $0x8] sm:$0xff]   ;;  %v1250_v16 = vld [vmem:[%s1404_s14] sm:$0xff]   ;;  %v1253_v38 = vld [vmem:[%s1436_s21 + $0x30] sm:$0xff]   ;;  %s393_s14 = scalar_lea.vmem %s1519_s6, %s1532_s24 }
  0x17   : > { %1124 = vmatpush3.bf16.msra.mxu0 %v1238_v4  ;;  %1145 = vmatprep.subr.bf16.mxu1 %v1308_v0  ;;  %v1251_v17 = vld [vmem:[%s369_s18] sm:$0xff]   ;;  %v1254_v39 = vld [vmem:[%s1436_s21 + $0x28] sm:$0xff]   ;;  %v1256_v41 = vld [vmem:[%s1436_s21 + $0x18] sm:$0xff]   ;;  %s1049_s18 = sshll.u32 %s400_s17, 2 }
  0x18   : > { %1125 = vmatprep.subr.bf16.mxu0 %v1308_v0  ;;  %v1060_v20 = vld [vmem:[%s390_s8] ss:$0 sm:$0xff]  ;;  %v1257_v42 = vld [vmem:[%s1436_s21 + $0x10] sm:$0xff]   ;;  %v1258_v43 = vld [vmem:[%s1436_s21 + $0x8] sm:$0xff]  }
  0x19   : > { %v1050_v23 = vld [vmem:[%s387_s11] ss:$0 sm:$0xff] }
  0x1a   : > { %1146 = vmatpush3.bf16.msra.mxu1 %v1239_v5  ;;  %v1255_v40 = vld [vmem:[%s1436_s21 + $0x20] sm:$0xff]  }
  0x1b   : > { %1126 = vmatpush3.bf16.msra.mxu0 %v1240_v6  ;;  %1147 = vmatprep.subr.bf16.mxu1 %v1308_v0  ;;  %v1259_v44 = vld [vmem:[%s1436_s21] sm:$0xff]   ;;  %s402_s21 = scalar_lea.vmem %s1520_s7, %s1049_s18 }
  0x1c   : > { %1127 = vmatprep.subr.bf16.mxu0 %v1308_v0  ;;  %v1069_v3 = vld [vmem:[%s393_s14] ss:$0 sm:$0xff] }
  0x1e   : > { %1148 = vmatpush3.bf16.msra.mxu1 %v1241_v7 }
  0x1f   : > { %1128 = vmatpush3.bf16.msra.mxu0 %v1242_v8  ;;  %1149 = vmatprep.subr.bf16.mxu1 %v1308_v0 }
  0x20   : > { %1129 = vmatprep.subr.bf16.mxu0 %v1308_v0 }
  0x22   : > { %1150 = vmatpush3.bf16.msra.mxu1 %v1243_v9 }
  0x23   : > { %1130 = vmatpush3.bf16.msra.mxu0 %v1244_v10  ;;  %1151 = vmatprep.subr.bf16.mxu1 %v1308_v0 }
  0x24   : > { %1131 = vmatprep.subr.bf16.mxu0 %v1308_v0 }
  0x26   : > { %1152 = vmatpush3.bf16.msra.mxu1 %v1245_v11 }
  0x27   : > { %1132 = vmatpush3.bf16.msra.mxu0 %v1246_v12  ;;  %1153 = vmatprep.subr.bf16.mxu1 %v1308_v0 }
  0x28   : > { %1133 = vmatprep.subr.bf16.mxu0 %v1308_v0 }
  0x2a   : > { %1154 = vmatpush3.bf16.msra.mxu1 %v1247_v13 }
  0x2b   : > { %1134 = vmatpush3.bf16.msra.mxu0 %v1248_v14  ;;  %1155 = vmatprep.subr.bf16.mxu1 %v1308_v0 }
  0x2c   : > { %1135 = vmatprep.subr.bf16.mxu0 %v1308_v0 }
  0x2e   : > { %1156 = vmatpush3.bf16.msra.mxu1 %v1249_v15 }
  0x2f   : > { %1136 = vmatpush3.bf16.msra.mxu0 %v1250_v16  ;;  %1181 = vmatprep.subr.bf16.mxu1 %v1308_v0 }
  0x30   : > { %1161 = vmatprep.subr.bf16.mxu0 %v1308_v0 }
  0x31   : > { %1158 = vmatmul.mubr.bf16.vlgmr.msra.gmra.mxu1 %v1251_v17 }
  0x32   : > { %1138 = vmatmul.mubr.bf16.vlgmr.msra.gmra.mxu0 %v1251_v17  ;;  %1183 = vmatprep.mubr.msk.bf16.mxu1 %vm1309_vm0, %v1308_v0 }
  0x33   : > { %1177 = vmatprep.mubr.msk.bf16.mxu0 %vm1309_vm0, %v1308_v0  ;;  %1162 = vmatpush3.bf16.msra.mxu0 %v1252_v37 }
  0x34   : > { %1163 = vmatprep.subr.bf16.mxu0 %v1308_v0 }
  0x37   : > { %1164 = vmatpush3.bf16.msra.mxu0 %v1253_v38 }
  0x38   : > { %1165 = vmatprep.subr.bf16.mxu0 %v1308_v0 }
  0x3b   : > { %1166 = vmatpush3.bf16.msra.mxu0 %v1254_v39 }
  0x3c   : > { %1167 = vmatprep.subr.bf16.mxu0 %v1308_v0 }
  0x3f   : > { %1168 = vmatpush3.bf16.msra.mxu0 %v1255_v40 }
  0x40   : > { %1169 = vmatprep.subr.bf16.mxu0 %v1308_v0 }
  0x43   : > { %1170 = vmatpush3.bf16.msra.mxu0 %v1256_v41 }
  0x44   : > { %1171 = vmatprep.subr.bf16.mxu0 %v1308_v0 }
  0x47   : > { %1172 = vmatpush3.bf16.msra.mxu0 %v1257_v42 }
  0x48   : > { %1173 = vmatprep.subr.bf16.mxu0 %v1308_v0 }
  0x4b   : > { %1174 = vmatpush3.bf16.msra.mxu0 %v1258_v43 }
  0x4c   : > { %1175 = vmatprep.subr.bf16.mxu0 %v1308_v0 }
  0x4f   : > { %1176 = vmatpush3.bf16.msra.mxu0 %v1259_v44 }
  0x52   : > { %1178 = vmatmul.mubr.bf16.vlgmr.msra.gmra.mxu0 %v1251_v17 }
  0xf1   : > { %v631_v18 = vpop.f32.mrf.mxu1 }
  0xf2   : > { %v517_v19 = vpop.f32.mrf.mxu0  ;;  %v632_v25 = vadd.f32 %v1060_v20, %v631_v18 }
  0xf3   : > { %v1159_v21 = vpop.f32.mrf.mxu1  ;;  %v518_v29 = vadd.f32 %v1050_v23, %v517_v19 }
  0xf4   : > { %v1139_v22 = vpop.f32.mrf.mxu0 }
  0xf5   : > { %v634_v24 = vpop.f32.mrf.mxu1  ;;  %v524_v34 = vmul.f32 0.17677669, %v518_v29 }
  0xf6   : > { %v635_v26 = vadd.f32 %v1060_v20, %v634_v24  ;;  %v520_v27 = vpop.f32.mrf.mxu0 }
  0xf7   : > { %v1160_v28 = vpop.f32.mrf.mxu1  ;;  %v521_v31 = vadd.f32 %v1050_v23, %v520_v27 }
  0xf8   : > { %v751_v30 = vpack.c.bf16 %v635_v26, %v632_v25  ;;  %v1140_v32 = vpop.f32.mrf.mxu0 }
  0xf9   : > { %v525_v35 = vmul.f32 0.17677669, %v521_v31 }
  0xfa   : > { %v757_v33 = vsel %vm752_vm1, %v751_v30, 0 }
  0xfb   : > { %1182 = vmatpush3.bf16.xpose.msra.mxu1 %v757_v33  ;;  %v750_v36 = vpack.c.bf16 %v525_v35, %v524_v34 }
  0xfc   : > { %1187 = vmatprep.subr.bf16.mxu1 %v1308_v0 }
 0x102   : > { %1184 = vmatmul.mubr.msk.bf16.vlgmr.msra.gmra.mxu1 %vm752_vm1, %v750_v36 }
 0x103   : > { %1189 = vmatprep.mubr.msk.bf16.mxu1 %vm1309_vm0, %v1308_v0 }
 0x112   : > { %v743_v1 = vpop.f32.mrf.mxu0 }
 0x113   : > { %v744_v5 = vadd.f32 %v1069_v3, %v743_v1 }
 0x114   : > { %v1179_v2 = vpop.f32.mrf.mxu0 }
 0x116   : > { %v746_v4 = vpop.f32.mrf.mxu0 }
 0x117   : > { %v747_v7 = vadd.f32 %v1069_v3, %v746_v4 }
 0x118   : > { %v1180_v6 = vpop.f32.mrf.mxu0 }
 0x119   : > { %v829_v8 = vpack.c.bf16 %v747_v7, %v744_v5 }
 0x11b   : > { %1188 = vmatpush3.bf16.msra.mxu1 %v829_v8 }
 0x1c2   : > { %v793_v47 = vpop.f32.mrf.mxu1 }
 0x1c3   : > { %v803_v48 = vsel %vm802_vm2, %v793_v47, -1e+30 }
 0x1c4   : > { %v1185_v49 = vpop.f32.mrf.mxu1  ;;  %v806_v50 = vsel %vm805_vm3, %v803_v48, -inf }
 0x1c5   : > { %807 = vmax.xlane.f32.xlu0 %v806_v50 }
 0x1c6   : > { %v796_v51 = vpop.f32.mrf.mxu1 }
 0x1c7   : > { %v804_v52 = vsel %vm802_vm2, %v796_v51, -1e+30 }
 0x1c8   : > { %v1186_v53 = vpop.f32.mrf.mxu1  ;;  %v809_v54 = vsel %vm805_vm3, %v804_v52, -inf }
 0x1c9   : > { %810 = vmax.xlane.f32.xlu0 %v809_v54 }
 0x24e   : > { %v808_v55 = vpop.xlane.xlu0 %807 }
 0x24f   : > { %v812_v56 = vsub.f32 %v803_v48, %v808_v55 }
 0x251   : > { %v814_v57 = vmul.f32 1.442695, %v812_v56 }
 0x252   : > { %v811_v58 = vpop.xlane.xlu0 %810 }
 0x253   : > { %1260 = vpow2.f32 %v814_v57  ;;  %v813_v59 = vsub.f32 %v804_v52, %v811_v58 }
 0x255   : > { %v816_v60 = vmul.f32 1.442695, %v813_v59 }
 0x257   : > { %1262 = vpow2.f32 %v816_v60 }
 0x260   : > { %v1261_v61 = vpop.eup %1260 }
 0x261   : > { %v818_v62 = vsel %vm805_vm3, %v1261_v61, 0.0 }
 0x262   : > { %819 = vadd.xlane.f32.xlu1 %v818_v62 }
 0x264   : > { %v1263_v63 = vpop.eup %1262 }
 0x265   : > { %v821_v0 = vsel %vm805_vm3, %v1263_v63, 0.0 }
 0x266   : > { %822 = vadd.xlane.f32.xlu1 %v821_v0 }
 0x2eb   : > { %v820_v9 = vpop.xlane.xlu1 %819 }
 0x2ec   : > { %1264 = vrcp.f32 %v820_v9 }
 0x2ef   : > { %v823_v10 = vpop.xlane.xlu1 %822 }
 0x2f0   : > { %1266 = vrcp.f32 %v823_v10 }
 0x2f9   : > { %v1265_v11 = vpop.eup %1264 }
 0x2fa   : > { %v826_v14 = vmul.f32 %v1265_v11, %v1261_v61 }
 0x2fd   : > { %v1267_v12 = vpop.eup %1266 }
 0x2fe   : > { %v827_v13 = vmul.f32 %v1267_v12, %v1263_v63 }
 0x300   : > { %v828_v15 = vpack.c.bf16 %v827_v13, %v826_v14 }
 0x302   : > { %1190 = vmatmul.mubr.msk.bf16.vlgmr.msra.gmra.mxu1 %vm805_vm3, %v828_v15 }
 0x3c2   : > { %v867_v16 = vpop.f32.mrf.mxu1 }
 0x3c3   : > { %v1088_v17 = vpack.c.bf16 %v867_v16, %v867_v16 }
 0x3c4   : > { %v1191_v18 = vpop.f32.mrf.mxu1 }
 0x3c5   : > { %883 = vst.msk [vmem:[%s402_s21] sm:$0xf] %vm882_vm4, %v1088_v17 }
 0x3c6   : > { %v870_v19 = vpop.f32.mrf.mxu1 }
 0x3c7   : > { %v1089_v20 = vpack.c.bf16 %v870_v19, %v870_v19 }
 0x3c8   : > { %v1192_v21 = vpop.f32.mrf.mxu1 }
 0x3c9   : > { %884 = vst.msk [vmem:[%s402_s21 + $0x4] sm:$0xf] %vm882_vm4, %v1089_v20 }
 0x3ca PF: > { %s17_s28 = sadd.s32 1, %s1306_s28   ;;  %s1521_s24 = smov %s1298_s26 }
 0x3cb   : > { %p14_p7 = scmp.ge.s32.totalorder %s17_s28, 10   ;;  %s1522_s25 = smov %s1302_s27 }
 0x3cc   : > { %s1523_s26 = smov %s1526_s29  ;;  %s1524_s27 = smov %s1530_s30 }
 0x3cd   :  { %16 = sbr.rel (!%p14_p7) target bundleno = 3 (0x3), region = 96 }

// kernel: vit_encoder_forward.12
= control target key start
LH: loop header
LB: loop body
LE: loop exit
PB: predicated region body
PF: predicated region fallthrough
CT: control target
= control target key end

     0   :  { %s658_s21 = smov 0   ;;  %s716_s0 = inlined_call_operand.vmem [shape: bf16[32,128], index: 0, kind: input, shape index: {}]   ;;  %s717_s1 = inlined_call_operand.vmem [shape: bf16[128,128], index: 1, kind: input, shape index: {}]   ;;  %s718_s2 = inlined_call_operand.vmem [shape: f32[1,128], index: 2, kind: input, shape index: {}]   ;;  %s719_s3 = inlined_call_operand.vmem [shape: bf16[32,128], index: 3, kind: input, shape index: {}]   ;;  %s720_s4 = inlined_call_operand.vmem [shape: f32[1,128], index: 4, kind: input, shape index: {}]   ;;  %s721_s5 = inlined_call_operand.vmem [shape: f32[1,128], index: 5, kind: input, shape index: {}]   ;;  %s722_s6 = inlined_call_operand.vmem [shape: bf16[32,128], index: 6, kind: output, shape index: {}]  }
   0x1 LB: > { %s523_s22 = sadd.s32 4294967295, %s619_s21   ;;  %p527_p0 = scmp.ge.s32.totalorder %s619_s21, 1  ;;  %s619_s21 = sphi %s658_s21, %s16_s21  }
   0x2   : > { %p224_p1 = scmp.lt.s32.totalorder %s619_s21, 3 }
   0x4   : > { %p225_p2 = pnand %p527_p0, %p224_p1 }
   0x5   : > { %s528_s27 = sshll.u32 (!%p225_p2), %s523_s22, 1 }
   0x6   : > { %228 = sbr.rel (%p225_p2) target bundleno = 554 (0x22a), region = 44  ;;  %p260_p3 = scmp.lt.s32.totalorder (!%p225_p2), %s528_s27, 3 }
   0xb   : > { %v600_v0 = vld [vmem:[%s717_s1 + $0x38] sm:$0xff]   ;;  %v621_v1 = vmov 0.0   ;;  %v601_v2 = vld [vmem:[%s717_s1 + $0x30] sm:$0xff]   ;;  %vm622_vm0 = vmmov 0   ;;  %s724_s27 = smov (!%p260_p3, %s528_s27), 3  ;;  %v602_v3 = vld [vmem:[%s717_s1 + $0x28] sm:$0xff]  }
   0xc   : > { %570 = vmatprep.subr.bf16.mxu0 %v621_v1  ;;  %586 = vmatprep.mubr.msk.bf16.mxu0 %vm622_vm0, %v621_v1  ;;  %s675_s30 = sshll.u32 %s724_s27, 2  ;;  %v603_v4 = vld [vmem:[%s717_s1 + $0x20] sm:$0xff]   ;;  %v604_v5 = vld [vmem:[%s717_s1 + $0x18] sm:$0xff]   ;;  %v605_v6 = vld [vmem:[%s717_s1 + $0x10] sm:$0xff]  }
   0xd   : > { %571 = vmatpush3.bf16.msra.mxu0 %v600_v0  ;;  %s263_s9 = scalar_lea.vmem %s716_s0, %s675_s30  ;;  %v606_v7 = vld [vmem:[%s717_s1 + $0x8] sm:$0xff]   ;;  %v607_v8 = vld [vmem:[%s717_s1] sm:$0xff]   ;;  %s269_s23 = scalar_lea.vmem %s719_s3, %s675_s30 }
   0xe   : > { %572 = vmatprep.subr.bf16.mxu0 %v621_v1  ;;  %v608_v9 = vld [vmem:[%s263_s9] sm:$0xff]   ;;  %s275_s9 = scalar_lea.vmem %s722_s6, %s675_s30 }
   0xf   : > { %v553_v10 = vld [vmem:[%s269_s23] sm:$0xff]  }
  0x10   : > { %v534_v11 = vld [vmem:[%s718_s2] ss:$0 sm:$0xff]  ;;  %v554_v12 = vunpack.c.l.bf16 %v553_v10  ;;  %v555_v17 = vunpack.c.h.bf16 %v553_v10 }
  0x11   : > { %573 = vmatpush3.bf16.msra.mxu0 %v601_v2  ;;  %v544_v38 = vld [vmem:[%s720_s4] ss:$0 sm:$0xff] }
  0x12   : > { %574 = vmatprep.subr.bf16.mxu0 %v621_v1  ;;  %v545_v42 = vld [vmem:[%s721_s5] ss:$0 sm:$0xff] }
  0x15   : > { %575 = vmatpush3.bf16.msra.mxu0 %v602_v3 }
  0x16   : > { %576 = vmatprep.subr.bf16.mxu0 %v621_v1 }
  0x19   : > { %577 = vmatpush3.bf16.msra.mxu0 %v603_v4 }
  0x1a   : > { %578 = vmatprep.subr.bf16.mxu0 %v621_v1 }
  0x1d   : > { %579 = vmatpush3.bf16.msra.mxu0 %v604_v5 }
  0x1e   : > { %580 = vmatprep.subr.bf16.mxu0 %v621_v1 }
  0x21   : > { %581 = vmatpush3.bf16.msra.mxu0 %v605_v6 }
  0x22   : > { %582 = vmatprep.subr.bf16.mxu0 %v621_v1 }
  0x25   : > { %583 = vmatpush3.bf16.msra.mxu0 %v606_v7 }
  0x26   : > { %584 = vmatprep.subr.bf16.mxu0 %v621_v1 }
  0x29   : > { %585 = vmatpush3.bf16.msra.mxu0 %v607_v8 }
  0x2c   : > { %587 = vmatmul.mubr.bf16.vlgmr.msra.gmra.mxu0 %v608_v9 }
  0xec   : > { %v391_v13 = vpop.f32.mrf.mxu0 }
  0xed   : > { %v392_v14 = vadd.f32 %v534_v11, %v391_v13 }
  0xee   : > { %v588_v15 = vpop.f32.mrf.mxu0 }
  0xef   : > { %v402_v16 = vadd.f32 %v554_v12, %v392_v14 }
  0xf0   : > { %v394_v18 = vpop.f32.mrf.mxu0 }
  0xf1   : > { %v395_v19 = vadd.f32 %v534_v11, %v394_v18  ;;  %404 = vadd.xlane.f32.xlu0 %v402_v16 }
  0xf2   : > { %v589_v20 = vpop.f32.mrf.mxu0 }
  0xf3   : > { %v403_v21 = vadd.f32 %v555_v17, %v395_v19 }
  0xf5   : > { %406 = vadd.xlane.f32.xlu0 %v403_v21 }
 0x17a   : > { %v405_v22 = vpop.xlane.xlu0 %404 }
 0x17b   : > { %v409_v23 = vmul.f32 0.0078125, %v405_v22 }
 0x17d   : > { %v411_v24 = vsub.f32 %v402_v16, %v409_v23 }
 0x17e   : > { %v407_v25 = vpop.xlane.xlu0 %406 }
 0x17f   : > { %v410_v26 = vmul.f32 0.0078125, %v407_v25  ;;  %v413_v27 = vmul.f32 %v411_v24, %v411_v24 }
 0x181   : > { %v412_v28 = vsub.f32 %v403_v21, %v410_v26  ;;  %415 = vadd.xlane.f32.xlu1 %v413_v27 }
 0x183   : > { %v414_v29 = vmul.f32 %v412_v28, %v412_v28 }
 0x185   : > { %417 = vadd.xlane.f32.xlu1 %v414_v29 }
 0x20a   : > { %v416_v30 = vpop.xlane.xlu1 %415 }
 0x20b   : > { %v419_v31 = vmul.f32 0.0078125, %v416_v30 }
 0x20d   : > { %v421_v32 = vadd.f32 1e-05, %v419_v31 }
 0x20e   : > { %v418_v33 = vpop.xlane.xlu1 %417 }
 0x20f   : > { %609 = vrsqrt.f32 %v421_v32  ;;  %v420_v34 = vmul.f32 0.0078125, %v418_v33 }
 0x211   : > { %v422_v35 = vadd.f32 1e-05, %v420_v34 }
 0x213   : > { %611 = vrsqrt.f32 %v422_v35 }
 0x21c   : > { %v610_v36 = vpop.eup %609 }
 0x21d   : > { %v425_v37 = vmul.f32 %v610_v36, %v411_v24 }
 0x21f   : > { %v434_v40 = vmul.f32 %v544_v38, %v425_v37 }
 0x220   : > { %v612_v39 = vpop.eup %611 }
 0x221   : > { %v426_v41 = vmul.f32 %v612_v39, %v412_v28  ;;  %v443_v44 = vadd.f32 %v545_v42, %v434_v40 }
 0x223   : > { %v435_v43 = vmul.f32 %v544_v38, %v426_v41 }
 0x225   : > { %v444_v45 = vadd.f32 %v545_v42, %v435_v43 }
 0x227   : > { %v559_v46 = vpack.c.bf16 %v444_v45, %v443_v44 }
 0x229   : > { %560 = vst [vmem:[%s275_s9] sm:$0xff] %v559_v46  }
 0x22a PF: > { %s16_s21 = sadd.s32 1, %s619_s21  }
 0x22b   : > { %p13_p4 = scmp.ge.s32.totalorder %s16_s21, 4  }
 0x22d   :  { %15 = sbr.rel (!%p13_p4) target bundleno = 1 (0x1), region = 77 }

// kernel: vit_encoder_forward.13
= control target key start
LH: loop header
LB: loop body
LE: loop exit
PB: predicated region body
PF: predicated region fallthrough
CT: control target
= control target key end

     0   :  { %s1111_s12 = smov 0   ;;  %s1113_s13 = smov 0   ;;  %s1391_s0 = inlined_call_operand.vmem [shape: bf16[32,128], index: 0, kind: input, shape index: {}]   ;;  %s1392_s1 = inlined_call_operand.vmem [shape: bf16[128,512], index: 1, kind: input, shape index: {}]   ;;  %s1393_s2 = inlined_call_operand.vmem [shape: f32[1,512], index: 2, kind: input, shape index: {}]   ;;  %s1394_s3 = inlined_call_operand.vmem [shape: bf16[32,512], index: 3, kind: output, shape index: {}]  }
   0x1   :  { %s1115_s14 = smov 0  }
   0x2 LB: > { %s25_s15 = sadd.s32 1, %s1084_s13  ;;  %p910_p0 = scmp.ge.s32.totalorder %s1088_s14, 1  ;;  %s1088_s14 = sphi %s1115_s14, %s13_s14   ;;  %s1084_s13 = sphi %s1113_s13, %s1396_s13   ;;  %s1080_s12 = sphi %s1111_s12, %s1395_s12  }
   0x3   : > { %p27_p1 = scmp.ge.s32.totalorder %s25_s15, 2  ;;  %p173_p2 = scmp.lt.s32.totalorder %s1088_s14, 3 }
   0x5   : > { %s1398_s15 = smov (%p27_p1, %s25_s15), 0  ;;  %p174_p3 = pnand %p910_p0, %p173_p2 }
   0x6   : > { %s911_s7 = sshll.u32 (!%p174_p3), %s1080_s12, 1 }
   0x7   : > { %177 = sbr.rel (%p174_p3) target bundleno = 309 (0x135), region = 32  ;;  %p212_p4 = scmp.lt.s32.totalorder (!%p174_p3), %s911_s7, 3 }
   0xc   : > { %v985_v0 = vld [vmem:[%s1392_s1 + $0xe4] ss:$16 sps:$4 sm:$0xff]   ;;  %v987_v1 = vld [vmem:[%s1392_s1 + $0xec] ss:$16 sps:$4 sm:$0xff]   ;;  %v1090_v2 = vmov 0   ;;  %s1400_s7 = smov (!%p212_p4, %s911_s7), 3  ;;  %v277_v34 = vlaneseq }
   0xd   : > { %495 = vmatprep.mubr.bf16.mxu0 %v1090_v2  ;;  %538 = vmatprep.mubr.bf16.mxu1 %v1090_v2  ;;  %v989_v3 = vld [vmem:[%s1392_s1 + $0xe0] ss:$16 sps:$4 sm:$0xff]   ;;  %v990_v4 = vld [vmem:[%s1392_s1 + $0xe8] ss:$16 sps:$4 sm:$0xff]   ;;  %v991_v5 = vld [vmem:[%s1392_s1 + $0xc4] ss:$16 sps:$4 sm:$0xff]  }
   0xe   : > { %463 = vmatprep.subr.bf16.mxu0 %v985_v0  ;;  %506 = vmatprep.subr.bf16.mxu1 %v987_v1  ;;  %v993_v6 = vld [vmem:[%s1392_s1 + $0xcc] ss:$16 sps:$4 sm:$0xff]   ;;  %v995_v7 = vld [vmem:[%s1392_s1 + $0xc0] ss:$16 sps:$4 sm:$0xff]   ;;  %v996_v8 = vld [vmem:[%s1392_s1 + $0xc8] ss:$16 sps:$4 sm:$0xff]  }
   0xf   : > { %464 = vmatpush1.bf16.msra.mxu0 %v989_v3  ;;  %507 = vmatpush1.bf16.msra.mxu1 %v990_v4  ;;  %v997_v9 = vld [vmem:[%s1392_s1 + $0xa4] ss:$16 sps:$4 sm:$0xff]   ;;  %v999_v10 = vld [vmem:[%s1392_s1 + $0xac] ss:$16 sps:$4 sm:$0xff]   ;;  %v1001_v11 = vld [vmem:[%s1392_s1 + $0xa0] ss:$16 sps:$4 sm:$0xff]  }
  0x10   : > { %465 = vmatprep.subr.bf16.mxu0 %v991_v5  ;;  %508 = vmatprep.subr.bf16.mxu1 %v993_v6  ;;  %v1002_v12 = vld [vmem:[%s1392_s1 + $0xa8] ss:$16 sps:$4 sm:$0xff]   ;;  %v1003_v13 = vld [vmem:[%s1392_s1 + $0x84] ss:$16 sps:$4 sm:$0xff]   ;;  %v1005_v14 = vld [vmem:[%s1392_s1 + $0x8c] ss:$16 sps:$4 sm:$0xff]  }
  0x11   : > { %v1007_v15 = vld [vmem:[%s1392_s1 + $0x80] ss:$16 sps:$4 sm:$0xff]   ;;  %v1008_v16 = vld [vmem:[%s1392_s1 + $0x88] ss:$16 sps:$4 sm:$0xff]   ;;  %v1009_v17 = vld [vmem:[%s1392_s1 + $0x64] ss:$16 sps:$4 sm:$0xff]  }
  0x12   : > { %v1011_v18 = vld [vmem:[%s1392_s1 + $0x6c] ss:$16 sps:$4 sm:$0xff]   ;;  %v1013_v19 = vld [vmem:[%s1392_s1 + $0x60] ss:$16 sps:$4 sm:$0xff]   ;;  %v1014_v20 = vld [vmem:[%s1392_s1 + $0x68] ss:$16 sps:$4 sm:$0xff]  }
  0x13   : > { %466 = vmatpush1.bf16.msra.mxu0 %v995_v7  ;;  %509 = vmatpush1.bf16.msra.mxu1 %v996_v8  ;;  %v1015_v21 = vld [vmem:[%s1392_s1 + $0x44] ss:$16 sps:$4 sm:$0xff]   ;;  %v1017_v22 = vld [vmem:[%s1392_s1 + $0x4c] ss:$16 sps:$4 sm:$0xff]   ;;  %s912_s11 = sshll.u32 %s1400_s7, 2  ;;  %v278_v35 = vshrl.u32 %v277_v34, 7 }
  0x14   : > { %467 = vmatprep.subr.bf16.mxu0 %v997_v9  ;;  %510 = vmatprep.subr.bf16.mxu1 %v999_v10  ;;  %v1019_v23 = vld [vmem:[%s1392_s1 + $0x40] ss:$16 sps:$4 sm:$0xff]   ;;  %v1020_v24 = vld [vmem:[%s1392_s1 + $0x48] ss:$16 sps:$4 sm:$0xff]   ;;  %v1021_v25 = vld [vmem:[%s1392_s1 + $0x24] ss:$16 sps:$4 sm:$0xff]   ;;  %s215_s23 = scalar_lea.vmem %s1391_s0, %s912_s11 }
  0x15   : > { %v1023_v26 = vld [vmem:[%s1392_s1 + $0x2c] ss:$16 sps:$4 sm:$0xff]   ;;  %v1025_v27 = vld [vmem:[%s1392_s1 + $0x20] ss:$16 sps:$4 sm:$0xff]   ;;  %v1026_v28 = vld [vmem:[%s1392_s1 + $0x28] ss:$16 sps:$4 sm:$0xff]  }
  0x16   : > { %v1027_v29 = vld [vmem:[%s1392_s1 + $0x4] ss:$16 sps:$4 sm:$0xff]   ;;  %v1029_v30 = vld [vmem:[%s1392_s1 + $0xc] ss:$16 sps:$4 sm:$0xff]   ;;  %v1031_v31 = vld [vmem:[%s1392_s1] ss:$16 sps:$4 sm:$0xff]  }
  0x17   : > { %468 = vmatpush1.bf16.msra.mxu0 %v1001_v11  ;;  %511 = vmatpush1.bf16.msra.mxu1 %v1002_v12  ;;  %v1032_v32 = vld [vmem:[%s1392_s1 + $0x8] ss:$16 sps:$4 sm:$0xff]   ;;  %v1033_v33 = vld [vmem:[%s215_s23] sm:$0xff]   ;;  %v279_v36 = vsub.s32 0, %v278_v35  ;;  %v287_v37 = vsub.s32 2, %v278_v35  ;;  %v283_v39 = vsub.s32 1, %v278_v35 }
  0x18   : > { %469 = vmatprep.subr.bf16.mxu0 %v1003_v13  ;;  %512 = vmatprep.subr.bf16.mxu1 %v1005_v14  ;;  %v275_v38 = vld [vmem:[%s1393_s2] sm:$0xf]  ;;  %v291_v40 = vsub.s32 3, %v278_v35  ;;  %s955_s18 = sshll.u32 %s1400_s7, 4 }
  0x19   : > { %v280_v41 = vrot.slane %v275_v38, %v279_v36  ;;  %v288_v42 = vrot.slane %v275_v38, %v287_v37  ;;  %v284_v45 = vrot.slane %v275_v38, %v283_v39  ;;  %s1365_s12 = scalar_lea.vmem %s1394_s3, %s955_s18 }
  0x1a   : > { %v292_v46 = vrot.slane %v275_v38, %v291_v40 }
  0x1b   : > { %470 = vmatpush1.bf16.msra.mxu0 %v1007_v15  ;;  %513 = vmatpush1.bf16.msra.mxu1 %v1008_v16 }
  0x1c   : > { %471 = vmatprep.subr.bf16.mxu0 %v1009_v17  ;;  %514 = vmatprep.subr.bf16.mxu1 %v1011_v18 }
  0x1f   : > { %472 = vmatpush1.bf16.msra.mxu0 %v1013_v19  ;;  %515 = vmatpush1.bf16.msra.mxu1 %v1014_v20 }
  0x20   : > { %473 = vmatprep.subr.bf16.mxu0 %v1015_v21  ;;  %516 = vmatprep.subr.bf16.mxu1 %v1017_v22 }
  0x23   : > { %474 = vmatpush1.bf16.msra.mxu0 %v1019_v23  ;;  %517 = vmatpush1.bf16.msra.mxu1 %v1020_v24 }
  0x24   : > { %475 = vmatprep.subr.bf16.mxu0 %v1021_v25  ;;  %518 = vmatprep.subr.bf16.mxu1 %v1023_v26 }
  0x27   : > { %476 = vmatpush1.bf16.msra.mxu0 %v1025_v27  ;;  %519 = vmatpush1.bf16.msra.mxu1 %v1026_v28 }
  0x28   : > { %477 = vmatprep.subr.bf16.mxu0 %v1027_v29  ;;  %520 = vmatprep.subr.bf16.mxu1 %v1029_v30 }
  0x2b   : > { %478 = vmatpush1.bf16.msra.mxu0 %v1031_v31  ;;  %521 = vmatpush1.bf16.msra.mxu1 %v1032_v32 }
  0x2e   : > { %496 = vmatmul.mubr.bf16.vlgmr.msra.gmra.mxu0 %v1033_v33  ;;  %539 = vmatmul.mubr.bf16.vlgmr.msra.gmra.mxu1 %v1033_v33 }
  0xee   : > { %v497_v43 = vpop.f32.mrf.mxu0  ;;  %v540_v44 = vpop.f32.mrf.mxu1 }
  0xef   : > { %v1237_v47 = vadd.f32 %v497_v43, %v280_v41  ;;  %v1239_v48 = vadd.f32 %v540_v44, %v288_v42 }
  0xf0   : > { %v499_v49 = vpop.f32.mrf.mxu0  ;;  %v542_v50 = vpop.f32.mrf.mxu1 }
  0xf1   : > { %v1242_v51 = vmul.f32 0.70710677, %v1237_v47  ;;  %v1245_v52 = vmul.f32 0.70710677, %v1239_v48  ;;  %v1247_v53 = vadd.f32 %v499_v49, %v284_v45  ;;  %v1249_v54 = vadd.f32 %v542_v50, %v292_v46 }
  0xf2   : > { %v501_v61 = vpop.f32.mrf.mxu0  ;;  %v544_v5 = vpop.f32.mrf.mxu1 }
  0xf3   : > { %v565_v55 = vand.u32 2147483647, %v1242_v51  ;;  %v567_v56 = vand.u32 2147483647, %v1245_v52  ;;  %v1254_v57 = vmul.f32 0.70710677, %v1247_v53  ;;  %v1261_v4 = vadd.f32 %v501_v61, %v280_v41 }
  0xf4   : > { %v1257_v58 = vmul.f32 0.70710677, %v1249_v54  ;;  %v503_v6 = vpop.f32.mrf.mxu0  ;;  %v1266_v10 = vadd.f32 %v544_v5, %v288_v42  ;;  %v546_v13 = vpop.f32.mrf.mxu1  ;;  %vm725_vm0 = vcmp.ge.f32.partialorder %v1242_v51, 0.0  ;;  %vm727_vm1 = vcmp.ge.f32.partialorder %v1245_v52, 0.0 }
  0xf5   : > { %v573_v59 = vmul.f32 0.3275911, %v565_v55  ;;  %v575_v60 = vmul.f32 0.3275911, %v567_v56  ;;  %v566_v62 = vand.u32 2147483647, %v1254_v57  ;;  %v1268_v11 = vadd.f32 %v503_v6, %v284_v45 }
  0xf6   : > { %v568_v63 = vand.u32 2147483647, %v1257_v58  ;;  %v1264_v9 = vmul.f32 0.70710677, %v1261_v4  ;;  %v677_v14 = vsub.f32 0.0, %v565_v55  ;;  %v679_v16 = vsub.f32 0.0, %v567_v56 }
  0xf7   : > { %v581_v0 = vadd.f32 1.0, %v573_v59  ;;  %v583_v1 = vadd.f32 1.0, %v575_v60  ;;  %v574_v2 = vmul.f32 0.3275911, %v566_v62  ;;  %v1272_v15 = vmul.f32 0.70710677, %v1266_v10 }
  0xf8   : > { %v576_v3 = vmul.f32 0.3275911, %v568_v63  ;;  %v569_v12 = vand.u32 2147483647, %v1264_v9  ;;  %v1275_v18 = vmul.f32 0.70710677, %v1268_v11  ;;  %v1278_v20 = vadd.f32 %v546_v13, %v292_v46 }
  0xf9   : > { %1034 = vrcp.f32 %v581_v0  ;;  %v582_v7 = vadd.f32 1.0, %v574_v2  ;;  %v571_v19 = vand.u32 2147483647, %v1272_v15  ;;  %v678_v21 = vsub.f32 0.0, %v566_v62 }
  0xfa   : > { %1036 = vrcp.f32 %v583_v1  ;;  %v584_v8 = vadd.f32 1.0, %v576_v3  ;;  %v577_v17 = vmul.f32 0.3275911, %v569_v12  ;;  %v570_v23 = vand.u32 2147483647, %v1275_v18 }
  0xfb   : > { %1038 = vrcp.f32 %v582_v7  ;;  %v685_v24 = vmul.f32 %v677_v14, %v565_v55  ;;  %v579_v25 = vmul.f32 0.3275911, %v571_v19  ;;  %v1282_v26 = vmul.f32 0.70710677, %v1278_v20 }
  0xfc   : > { %1040 = vrcp.f32 %v584_v8  ;;  %v585_v22 = vadd.f32 1.0, %v577_v17  ;;  %v687_v27 = vmul.f32 %v679_v16, %v567_v56  ;;  %v680_v28 = vsub.f32 0.0, %v568_v63 }
  0xfd   : > { %v578_v29 = vmul.f32 0.3275911, %v570_v23  ;;  %v681_v30 = vsub.f32 0.0, %v569_v12  ;;  %v587_v31 = vadd.f32 1.0, %v579_v25  ;;  %v572_v32 = vand.u32 2147483647, %v1282_v26 }
  0xfe   : > { %1042 = vrcp.f32 %v585_v22  ;;  %v686_v33 = vmul.f32 %v678_v21, %v566_v62  ;;  %v693_v36 = vmul.f32 1.442695, %v685_v24  ;;  %v683_v37 = vsub.f32 0.0, %v571_v19 }
  0xff   : > { %v586_v34 = vadd.f32 1.0, %v578_v29  ;;  %1044 = vrcp.f32 %v587_v31  ;;  %v580_v38 = vmul.f32 0.3275911, %v572_v32  ;;  %v697_v41 = vmul.f32 1.442695, %v687_v27 }
 0x100   : > { %v688_v42 = vmul.f32 %v680_v28, %v568_v63  ;;  %v689_v44 = vmul.f32 %v681_v30, %v569_v12  ;;  %v682_v45 = vsub.f32 0.0, %v570_v23  ;;  %v695_v50 = vmul.f32 1.442695, %v686_v33 }
 0x101   : > { %1046 = vrcp.f32 %v586_v34  ;;  %v588_v46 = vadd.f32 1.0, %v580_v38  ;;  %v691_v59 = vmul.f32 %v683_v37, %v571_v19  ;;  %v684_v60 = vsub.f32 0.0, %v572_v32 }
 0x102   : > { %v699_v63 = vmul.f32 1.442695, %v688_v42  ;;  %v701_v2 = vmul.f32 1.442695, %v689_v44  ;;  %v690_v3 = vmul.f32 %v682_v45, %v570_v23  ;;  %v1304_v21 = vmul.f32 0.5, %v1237_v47 }
 0x103   : > { %1048 = vrcp.f32 %v588_v46  ;;  %v705_v12 = vmul.f32 1.442695, %v691_v59  ;;  %v692_v13 = vmul.f32 %v684_v60, %v572_v32  ;;  %v1310_v29 = vmul.f32 0.5, %v1239_v48 }
 0x104   : > { %1050 = vpow2.f32 %v693_v36  ;;  %v703_v23 = vmul.f32 1.442695, %v690_v3  ;;  %vm726_vm2 = vcmp.ge.f32.partialorder %v1254_v57, 0.0  ;;  %vm728_vm3 = vcmp.ge.f32.partialorder %v1257_v58, 0.0 }
 0x105   : > { %1052 = vpow2.f32 %v697_v41  ;;  %v707_v31 = vmul.f32 1.442695, %v692_v13  ;;  %vm729_vm4 = vcmp.ge.f32.partialorder %v1264_v9, 0.0  ;;  %vm730_vm5 = vcmp.ge.f32.partialorder %v1275_v18, 0.0 }
 0x106   : > { %v1285_v35 = vpop.eup %1034  ;;  %1054 = vpow2.f32 %v695_v50  ;;  %vm731_vm6 = vcmp.ge.f32.partialorder %v1272_v15, 0.0  ;;  %vm732_vm7 = vcmp.ge.f32.partialorder %v1282_v26, 0.0  ;;  %v556_v15 = vmul.f32 0.5, %v1278_v20 }
 0x107   : > { %v1287_v39 = vpop.eup %1036  ;;  %v605_v40 = vmul.f32 1.0614054, %v1285_v35  ;;  %1056 = vpow2.f32 %v699_v63 }
 0x108   : > { %v607_v43 = vmul.f32 1.0614054, %v1287_v39  ;;  %v1291_v55 = vpop.eup %1038  ;;  %1058 = vpow2.f32 %v701_v2 }
 0x109   : > { %v613_v49 = vadd.f32 -1.4531521, %v605_v40  ;;  %v606_v62 = vmul.f32 1.0614054, %v1291_v55  ;;  %v1295_v0 = vpop.eup %1040  ;;  %1060 = vpow2.f32 %v705_v12  ;;  %v1320_v40 = vmul.f32 0.5, %v1247_v53 }
 0x10a   : > { %v615_v56 = vadd.f32 -1.4531521, %v607_v43  ;;  %v608_v7 = vmul.f32 1.0614054, %v1295_v0  ;;  %1062 = vpow2.f32 %v703_v23 }
 0x10b   : > { %v621_v61 = vmul.f32 %v1285_v35, %v613_v49  ;;  %v614_v6 = vadd.f32 -1.4531521, %v606_v62  ;;  %v1301_v19 = vpop.eup %1042  ;;  %1064 = vpow2.f32 %v707_v31 }
 0x10c   : > { %v623_v1 = vmul.f32 %v1287_v39, %v615_v56  ;;  %v616_v17 = vadd.f32 -1.4531521, %v608_v7  ;;  %v609_v28 = vmul.f32 1.0614054, %v1301_v19  ;;  %v1312_v32 = vpop.eup %1044 }
 0x10d   : > { %v629_v5 = vadd.f32 1.4214138, %v621_v61  ;;  %v622_v16 = vmul.f32 %v1291_v55, %v614_v6  ;;  %v611_v48 = vmul.f32 1.0614054, %v1312_v32 }
 0x10e   : > { %v631_v8 = vadd.f32 1.4214138, %v623_v1  ;;  %v624_v27 = vmul.f32 %v1295_v0, %v616_v17  ;;  %v617_v36 = vadd.f32 -1.4531521, %v609_v28  ;;  %v1316_v37 = vpop.eup %1046 }
 0x10f   : > { %v637_v14 = vmul.f32 %v1285_v35, %v629_v5  ;;  %v630_v25 = vadd.f32 1.4214138, %v622_v16  ;;  %v619_v46 = vadd.f32 -1.4531521, %v611_v48  ;;  %v610_v49 = vmul.f32 1.0614054, %v1316_v37 }
 0x110   : > { %v639_v22 = vmul.f32 %v1287_v39, %v631_v8  ;;  %v632_v34 = vadd.f32 1.4214138, %v624_v27  ;;  %v625_v44 = vmul.f32 %v1301_v19, %v617_v36  ;;  %v1327_v50 = vpop.eup %1048 }
 0x111   : > { %v645_v24 = vadd.f32 -0.28449672, %v637_v14  ;;  %v638_v33 = vmul.f32 %v1291_v55, %v630_v25  ;;  %v1051_v61 = vpop.eup %1050  ;;  %v627_v63 = vmul.f32 %v1312_v32, %v619_v46  ;;  %v618_v1 = vadd.f32 -1.4531521, %v610_v49 }
 0x112   : > { %v647_v30 = vadd.f32 -0.28449672, %v639_v22  ;;  %v640_v43 = vmul.f32 %v1295_v0, %v632_v34  ;;  %v633_v60 = vadd.f32 1.4214138, %v625_v44  ;;  %v612_v2 = vmul.f32 1.0614054, %v1327_v50  ;;  %v1053_v3 = vpop.eup %1052 }
 0x113   : > { %v653_v47 = vmul.f32 %v1285_v35, %v645_v24  ;;  %v646_v42 = vadd.f32 -0.28449672, %v638_v33  ;;  %v635_v12 = vadd.f32 1.4214138, %v627_v63  ;;  %v626_v13 = vmul.f32 %v1316_v37, %v618_v1  ;;  %v1055_v16 = vpop.eup %1054 }
 0x114   : > { %v655_v38 = vmul.f32 %v1287_v39, %v647_v30  ;;  %v648_v59 = vadd.f32 -0.28449672, %v640_v43  ;;  %v620_v14 = vadd.f32 -1.4531521, %v612_v2  ;;  %v1057_v24 = vpop.eup %1056 }
 0x115   : > { %v661_v41 = vadd.f32 0.2548296, %v653_v47  ;;  %v654_v56 = vmul.f32 %v1291_v55, %v646_v42  ;;  %v643_v27 = vmul.f32 %v1312_v32, %v635_v12  ;;  %v634_v28 = vadd.f32 1.4214138, %v626_v13  ;;  %v1059_v31 = vpop.eup %1058 }
 0x116   : > { %v663_v45 = vadd.f32 0.2548296, %v655_v38  ;;  %v656_v7 = vmul.f32 %v1295_v0, %v648_v59  ;;  %v628_v30 = vmul.f32 %v1327_v50, %v620_v14  ;;  %v1061_v42 = vpop.eup %1060  ;;  %v552_v12 = vmul.f32 0.5, %v1249_v54 }
 0x117   : > { %v669_v53 = vmul.f32 %v1285_v35, %v661_v41  ;;  %v662_v6 = vadd.f32 0.2548296, %v654_v56  ;;  %v641_v35 = vmul.f32 %v1301_v19, %v633_v60  ;;  %v651_v48 = vadd.f32 -0.28449672, %v643_v27  ;;  %v1063_v56 = vpop.eup %1062 }
 0x118   : > { %v671_v62 = vmul.f32 %v1287_v39, %v663_v45  ;;  %v664_v22 = vadd.f32 0.2548296, %v656_v7  ;;  %v636_v41 = vadd.f32 1.4214138, %v628_v30  ;;  %v1065_v1 = vpop.eup %1064 }
 0x119   : > { %v709_v5 = vmul.f32 %v1051_v61, %v669_v53  ;;  %v670_v39 = vmul.f32 %v1291_v55, %v662_v6  ;;  %v649_v23 = vadd.f32 -0.28449672, %v641_v35  ;;  %v642_v55 = vmul.f32 %v1316_v37, %v634_v28 }
 0x11a   : > { %v711_v8 = vmul.f32 %v1053_v3, %v671_v62  ;;  %v672_v34 = vmul.f32 %v1295_v0, %v664_v22  ;;  %v659_v0 = vmul.f32 %v1312_v32, %v651_v48  ;;  %v644_v52 = vmul.f32 %v1327_v50, %v636_v41 }
 0x11b   : > { %v717_v17 = vsub.f32 1.0, %v709_v5  ;;  %v710_v33 = vmul.f32 %v1055_v16, %v670_v39  ;;  %v657_v36 = vmul.f32 %v1301_v19, %v649_v23  ;;  %v650_v53 = vadd.f32 -0.28449672, %v642_v55 }
 0x11c   : > { %v719_v25 = vsub.f32 1.0, %v711_v8  ;;  %v712_v45 = vmul.f32 %v1057_v24, %v672_v34  ;;  %v667_v51 = vadd.f32 0.2548296, %v659_v0  ;;  %v652_v8 = vadd.f32 -0.28449672, %v644_v52 }
 0x11d   : > { %v733_v47 = vsub.f32 0.0, %v717_v17  ;;  %v718_v44 = vsub.f32 1.0, %v710_v33  ;;  %v665_v46 = vadd.f32 0.2548296, %v657_v36  ;;  %v658_v63 = vmul.f32 %v1316_v37, %v650_v53 }
 0x11e   : > { %v735_v38 = vsub.f32 0.0, %v719_v25  ;;  %v720_v61 = vsub.f32 1.0, %v712_v45  ;;  %v675_v7 = vmul.f32 %v1312_v32, %v667_v51  ;;  %v660_v58 = vmul.f32 %v1327_v50, %v652_v8 }
 0x11f   : > { %v741_v43 = vsel %vm725_vm0, %v717_v17, %v733_v47  ;;  %v734_v60 = vsub.f32 0.0, %v718_v44  ;;  %v673_v62 = vmul.f32 %v1301_v19, %v665_v46  ;;  %v666_v35 = vadd.f32 0.2548296, %v658_v63 }
 0x120   : > { %v743_v49 = vsel %vm727_vm1, %v719_v25, %v735_v38  ;;  %v749_v59 = vadd.f32 1.0, %v741_v43  ;;  %v736_v3 = vsub.f32 0.0, %v720_v61  ;;  %v715_v39 = vmul.f32 %v1061_v42, %v675_v7 }
 0x121   : > { %v751_v2 = vadd.f32 1.0, %v743_v49  ;;  %v742_v57 = vsel %vm726_vm2, %v718_v44, %v734_v60  ;;  %v713_v5 = vmul.f32 %v1059_v31, %v673_v62  ;;  %v674_v22 = vmul.f32 %v1316_v37, %v666_v35 }
 0x122   : > { %v750_v6 = vadd.f32 1.0, %v742_v57  ;;  %v757_v19 = vmul.f32 %v749_v59, %v1304_v21  ;;  %v744_v13 = vsel %vm728_vm3, %v720_v61, %v736_v3  ;;  %v723_v24 = vsub.f32 1.0, %v715_v39 }
 0x123   : > { %v721_v14 = vsub.f32 1.0, %v713_v5  ;;  %v752_v17 = vadd.f32 1.0, %v744_v13  ;;  %v759_v21 = vmul.f32 %v751_v2, %v1310_v29  ;;  %v668_v25 = vadd.f32 0.2548296, %v660_v58 }
 0x124   : > { %v758_v16 = vmul.f32 %v750_v6, %v1320_v40  ;;  %v714_v40 = vmul.f32 %v1063_v56, %v674_v22  ;;  %v739_v30 = vsub.f32 0.0, %v723_v24  ;;  %v553_v34 = vmul.f32 0.5, %v1261_v4 }
 0x125   : > { %v737_v54 = vsub.f32 0.0, %v721_v14  ;;  %v760_v23 = vmul.f32 %v752_v17, %v552_v12  ;;  %v676_v31 = vmul.f32 %v1327_v50, %v668_v25  ;;  %v554_v38 = vmul.f32 0.5, %v1268_v11 }
 0x126   : > { %v956_v32 = vpack.c.bf16 %v758_v16, %v757_v19  ;;  %v722_v28 = vsub.f32 1.0, %v714_v40  ;;  %v747_v36 = vsel %vm731_vm6, %v723_v24, %v739_v30  ;;  %v555_v4 = vmul.f32 0.5, %v1266_v10 }
 0x127   : > { %v957_v37 = vpack.c.bf16 %v760_v23, %v759_v21  ;;  %v745_v27 = vsel %vm729_vm4, %v721_v14, %v737_v54  ;;  %v716_v33 = vmul.f32 %v1065_v1, %v676_v31  ;;  %v755_v43 = vadd.f32 1.0, %v747_v36 }
 0x128   : > { %789 = vst [vmem:[%s1365_s12] sm:$0xff] %v956_v32  ;;  %v738_v47 = vsub.f32 0.0, %v722_v28  ;;  %v753_v29 = vadd.f32 1.0, %v745_v27 }
 0x129   : > { %790 = vst [vmem:[%s1365_s12 + $0x8] sm:$0xff] %v957_v37  ;;  %v724_v55 = vsub.f32 1.0, %v716_v33  ;;  %v763_v46 = vmul.f32 %v755_v43, %v555_v4 }
 0x12a   : > { %v746_v9 = vsel %vm730_vm5, %v722_v28, %v738_v47  ;;  %v761_v41 = vmul.f32 %v753_v29, %v553_v34 }
 0x12b   : > { %v754_v48 = vadd.f32 1.0, %v746_v9  ;;  %v740_v42 = vsub.f32 0.0, %v724_v55 }
 0x12d   : > { %v762_v50 = vmul.f32 %v754_v48, %v554_v38  ;;  %v748_v44 = vsel %vm732_vm7, %v724_v55, %v740_v42 }
 0x12e   : > { %v756_v45 = vadd.f32 1.0, %v748_v44 }
 0x12f   : > { %v958_v18 = vpack.c.bf16 %v762_v50, %v761_v41 }
 0x130   : > { %v764_v49 = vmul.f32 %v756_v45, %v556_v15 }
 0x131   : > { %791 = vst [vmem:[%s1365_s12 + $0x10] sm:$0xff] %v958_v18 }
 0x132   : > { %v959_v11 = vpack.c.bf16 %v764_v49, %v763_v46 }
 0x134   : > { %792 = vst [vmem:[%s1365_s12 + $0x18] sm:$0xff] %v959_v11 }
 0x135 PF: > { %s13_s14 = sadd.s32 1, %s1088_s14   ;;  %s1395_s12 = smov %s1084_s13 }
 0x136   : > { %p10_p5 = scmp.ge.s32.totalorder %s13_s14, 4   ;;  %s1396_s13 = smov %s1398_s15 }
 0x138   :  { %12 = sbr.rel (!%p10_p5) target bundleno = 2 (0x2), region = 68 }

// kernel: vit_encoder_forward.14
= control target key start
LH: loop header
LB: loop body
LE: loop exit
PB: predicated region body
PF: predicated region fallthrough
CT: control target
= control target key end

     0   :  { %s979_s21 = smov 0   ;;  %s1114_s0 = inlined_call_operand.vmem [shape: bf16[32,512], index: 0, kind: input, shape index: {}]   ;;  %s1115_s1 = inlined_call_operand.vmem [shape: bf16[512,128], index: 1, kind: input, shape index: {}]   ;;  %s1116_s2 = inlined_call_operand.vmem [shape: f32[1,128], index: 2, kind: input, shape index: {}]   ;;  %s1117_s3 = inlined_call_operand.vmem [shape: bf16[32,128], index: 3, kind: input, shape index: {}]   ;;  %s1118_s4 = inlined_call_operand.vmem [shape: f32[1,128], index: 4, kind: input, shape index: {}]   ;;  %s1119_s5 = inlined_call_operand.vmem [shape: f32[1,128], index: 5, kind: input, shape index: {}]   ;;  %s1120_s6 = inlined_call_operand.vmem [shape: bf16[32,128], index: 6, kind: output, shape index: {}]  }
   0x1 LB: > { %s775_s22 = sadd.s32 4294967295, %s942_s21   ;;  %p779_p0 = scmp.ge.s32.totalorder %s942_s21, 1  ;;  %s942_s21 = sphi %s979_s21, %s16_s21  }
   0x2   : > { %p225_p1 = scmp.lt.s32.totalorder %s942_s21, 3 }
   0x4   : > { %p226_p2 = pnand %p779_p0, %p225_p1 }
   0x5   : > { %s780_s9 = sshll.u32 (!%p226_p2), %s775_s22, 1 }
   0x6   : > { %229 = sbr.rel (%p226_p2) target bundleno = 561 (0x231), region = 44  ;;  %p262_p3 = scmp.lt.s32.totalorder (!%p226_p2), %s780_s9, 3 }
   0xb   : > { %v894_v0 = vld [vmem:[%s1115_s1 + $0x78] sm:$0xff]   ;;  %v898_v4 = vld [vmem:[%s1115_s1 + $0x70] sm:$0xff]   ;;  %v902_v8 = vld [vmem:[%s1115_s1 + $0x68] sm:$0xff]   ;;  %s1122_s9 = smov (!%p262_p3, %s780_s9), 3 }
   0xc   : > { %v895_v1 = vld [vmem:[%s1115_s1 + $0xf8] sm:$0xff]   ;;  %842 = vmatprep.subr.bf16.mxu0 %v894_v0  ;;  %v899_v5 = vld [vmem:[%s1115_s1 + $0xf0] sm:$0xff]   ;;  %v903_v9 = vld [vmem:[%s1115_s1 + $0xe8] sm:$0xff]   ;;  %s830_s10 = sshll.u32 %s1122_s9, 4  ;;  %s784_s25 = sshll.u32 %s1122_s9, 2 }
   0xd   : > { %v896_v2 = vld [vmem:[%s1115_s1 + $0x38] sm:$0xff]   ;;  %864 = vmatprep.subr.bf16.mxu1 %v895_v1  ;;  %v900_v6 = vld [vmem:[%s1115_s1 + $0x30] sm:$0xff]   ;;  %v904_v10 = vld [vmem:[%s1115_s1 + $0x28] sm:$0xff]   ;;  %s266_s18 = scalar_lea.vmem %s1114_s0, %s830_s10  ;;  %s272_s28 = scalar_lea.vmem %s1117_s3, %s784_s25 }
   0xe   : > { %v897_v3 = vld [vmem:[%s1115_s1 + $0xb8] sm:$0xff]   ;;  %843 = vmatpush3.bf16.msra.mxu0 %v896_v2  ;;  %v901_v7 = vld [vmem:[%s1115_s1 + $0xb0] sm:$0xff]   ;;  %v905_v11 = vld [vmem:[%s1115_s1 + $0xa8] sm:$0xff]   ;;  %s278_s14 = scalar_lea.vmem %s1120_s6, %s784_s25 }
   0xf   : > { %865 = vmatpush3.bf16.msra.mxu1 %v897_v3  ;;  %844 = vmatprep.subr.bf16.mxu0 %v898_v4  ;;  %v906_v12 = vld [vmem:[%s1115_s1 + $0x60] sm:$0xff]   ;;  %v910_v16 = vld [vmem:[%s1115_s1 + $0x58] sm:$0xff]   ;;  %v914_v20 = vld [vmem:[%s1115_s1 + $0x50] sm:$0xff]  }
  0x10   : > { %866 = vmatprep.subr.bf16.mxu1 %v899_v5  ;;  %v907_v13 = vld [vmem:[%s1115_s1 + $0xe0] sm:$0xff]   ;;  %v911_v17 = vld [vmem:[%s1115_s1 + $0xd8] sm:$0xff]   ;;  %v915_v21 = vld [vmem:[%s1115_s1 + $0xd0] sm:$0xff]  }
  0x11   : > { %v908_v14 = vld [vmem:[%s1115_s1 + $0x20] sm:$0xff]   ;;  %v912_v18 = vld [vmem:[%s1115_s1 + $0x18] sm:$0xff]   ;;  %v916_v22 = vld [vmem:[%s1115_s1 + $0x10] sm:$0xff]  }
  0x12   : > { %845 = vmatpush3.bf16.msra.mxu0 %v900_v6  ;;  %v909_v15 = vld [vmem:[%s1115_s1 + $0xa0] sm:$0xff]   ;;  %v913_v19 = vld [vmem:[%s1115_s1 + $0x98] sm:$0xff]   ;;  %v917_v23 = vld [vmem:[%s1115_s1 + $0x90] sm:$0xff]  }
  0x13   : > { %867 = vmatpush3.bf16.msra.mxu1 %v901_v7  ;;  %846 = vmatprep.subr.bf16.mxu0 %v902_v8  ;;  %v918_v24 = vld [vmem:[%s1115_s1 + $0x48] sm:$0xff]   ;;  %v922_v28 = vld [vmem:[%s1115_s1 + $0x40] sm:$0xff]  }
  0x14   : > { %868 = vmatprep.subr.bf16.mxu1 %v903_v9  ;;  %v919_v25 = vld [vmem:[%s1115_s1 + $0xc8] sm:$0xff]   ;;  %v923_v29 = vld [vmem:[%s1115_s1 + $0xc0] sm:$0xff]  }
  0x15   : > { %v920_v26 = vld [vmem:[%s1115_s1 + $0x8] sm:$0xff]   ;;  %v924_v30 = vld [vmem:[%s1115_s1] sm:$0xff]  }
  0x16   : > { %847 = vmatpush3.bf16.msra.mxu0 %v904_v10  ;;  %v921_v27 = vld [vmem:[%s1115_s1 + $0x88] sm:$0xff]   ;;  %v925_v31 = vld [vmem:[%s1115_s1 + $0x80] sm:$0xff]  }
  0x17   : > { %869 = vmatpush3.bf16.msra.mxu1 %v905_v11  ;;  %848 = vmatprep.subr.bf16.mxu0 %v906_v12  ;;  %v926_v32 = vld [vmem:[%s266_s18] ss:$16 sps:$4 sm:$0xff]   ;;  %v928_v33 = vld [vmem:[%s266_s18 + $0x4] ss:$16 sps:$4 sm:$0xff]   ;;  %v929_v34 = vld [vmem:[%s266_s18 + $0x8] ss:$16 sps:$4 sm:$0xff]  }
  0x18   : > { %870 = vmatprep.subr.bf16.mxu1 %v907_v13  ;;  %v931_v35 = vld [vmem:[%s266_s18 + $0xc] ss:$16 sps:$4 sm:$0xff]   ;;  %600 = vmatprep.mubr.bf16.mxu0 %v928_v33  ;;  %v787_v38 = vld [vmem:[%s1116_s2] ss:$0 sm:$0xff] }
  0x19   : > { %641 = vmatprep.mubr.bf16.mxu1 %v931_v35  ;;  %v834_v40 = vld [vmem:[%s272_s28] sm:$0xff]  }
  0x1a   : > { %849 = vmatpush3.bf16.msra.mxu0 %v908_v14  ;;  %v835_v47 = vunpack.c.l.bf16 %v834_v40  ;;  %v836_v55 = vunpack.c.h.bf16 %v834_v40  ;;  %v824_v10 = vld [vmem:[%s1118_s4] ss:$0 sm:$0xff] }
  0x1b   : > { %871 = vmatpush3.bf16.msra.mxu1 %v909_v15  ;;  %850 = vmatprep.subr.bf16.mxu0 %v910_v16  ;;  %v825_v14 = vld [vmem:[%s1119_s5] ss:$0 sm:$0xff] }
  0x1c   : > { %872 = vmatprep.subr.bf16.mxu1 %v911_v17 }
  0x1e   : > { %851 = vmatpush3.bf16.msra.mxu0 %v912_v18 }
  0x1f   : > { %873 = vmatpush3.bf16.msra.mxu1 %v913_v19  ;;  %852 = vmatprep.subr.bf16.mxu0 %v914_v20 }
  0x20   : > { %874 = vmatprep.subr.bf16.mxu1 %v915_v21 }
  0x22   : > { %853 = vmatpush3.bf16.msra.mxu0 %v916_v22 }
  0x23   : > { %875 = vmatpush3.bf16.msra.mxu1 %v917_v23  ;;  %854 = vmatprep.subr.bf16.mxu0 %v918_v24 }
  0x24   : > { %876 = vmatprep.subr.bf16.mxu1 %v919_v25 }
  0x26   : > { %855 = vmatpush3.bf16.msra.mxu0 %v920_v26 }
  0x27   : > { %877 = vmatpush3.bf16.msra.mxu1 %v921_v27  ;;  %856 = vmatprep.subr.bf16.mxu0 %v922_v28 }
  0x28   : > { %878 = vmatprep.subr.bf16.mxu1 %v923_v29 }
  0x2a   : > { %857 = vmatpush3.bf16.msra.mxu0 %v924_v30 }
  0x2b   : > { %879 = vmatpush3.bf16.msra.mxu1 %v925_v31 }
  0x2d   : > { %601 = vmatmul.mubr.bf16.vlgmr.msra.gmra.mxu0 %v926_v32 }
  0x2e   : > { %642 = vmatmul.mubr.bf16.vlgmr.msra.gmra.mxu1 %v929_v34 }
  0xed   : > { %v858_v36 = vpop.f32.mrf.mxu0 }
  0xee   : > { %v880_v37 = vpop.f32.mrf.mxu1 }
  0xef   : > { %v859_v39 = vpop.f32.mrf.mxu0 }
  0xf0   : > { %v860_v41 = vadd.f32 %v859_v39, %v858_v36  ;;  %v881_v42 = vpop.f32.mrf.mxu1 }
  0xf1   : > { %v861_v43 = vpop.f32.mrf.mxu0  ;;  %v882_v45 = vadd.f32 %v881_v42, %v880_v37 }
  0xf2   : > { %v603_v44 = vadd.f32 %v860_v41, %v787_v38  ;;  %v883_v46 = vpop.f32.mrf.mxu1 }
  0xf3   : > { %v862_v48 = vpop.f32.mrf.mxu0 }
  0xf4   : > { %v644_v49 = vadd.f32 %v882_v45, %v603_v44  ;;  %v863_v50 = vadd.f32 %v862_v48, %v861_v43  ;;  %v884_v51 = vpop.f32.mrf.mxu1 }
  0xf5   : > { %v885_v53 = vadd.f32 %v884_v51, %v883_v46 }
  0xf6   : > { %v606_v52 = vadd.f32 %v863_v50, %v787_v38  ;;  %v654_v54 = vadd.f32 %v835_v47, %v644_v49 }
  0xf8   : > { %v647_v56 = vadd.f32 %v885_v53, %v606_v52  ;;  %656 = vadd.xlane.f32.xlu0 %v654_v54 }
  0xfa   : > { %v655_v57 = vadd.f32 %v836_v55, %v647_v56 }
  0xfc   : > { %658 = vadd.xlane.f32.xlu0 %v655_v57 }
 0x181   : > { %v657_v58 = vpop.xlane.xlu0 %656 }
 0x182   : > { %v661_v59 = vmul.f32 0.0078125, %v657_v58 }
 0x184   : > { %v663_v60 = vsub.f32 %v654_v54, %v661_v59 }
 0x185   : > { %v659_v61 = vpop.xlane.xlu0 %658 }
 0x186   : > { %v662_v62 = vmul.f32 0.0078125, %v659_v61  ;;  %v665_v63 = vmul.f32 %v663_v60, %v663_v60 }
 0x188   : > { %v664_v0 = vsub.f32 %v655_v57, %v662_v62  ;;  %667 = vadd.xlane.f32.xlu1 %v665_v63 }
 0x18a   : > { %v666_v1 = vmul.f32 %v664_v0, %v664_v0 }
 0x18c   : > { %669 = vadd.xlane.f32.xlu1 %v666_v1 }
 0x211   : > { %v668_v2 = vpop.xlane.xlu1 %667 }
 0x212   : > { %v671_v3 = vmul.f32 0.0078125, %v668_v2 }
 0x214   : > { %v673_v4 = vadd.f32 1e-05, %v671_v3 }
 0x215   : > { %v670_v5 = vpop.xlane.xlu1 %669 }
 0x216   : > { %932 = vrsqrt.f32 %v673_v4  ;;  %v672_v6 = vmul.f32 0.0078125, %v670_v5 }
 0x218   : > { %v674_v7 = vadd.f32 1e-05, %v672_v6 }
 0x21a   : > { %934 = vrsqrt.f32 %v674_v7 }
 0x223   : > { %v933_v8 = vpop.eup %932 }
 0x224   : > { %v677_v9 = vmul.f32 %v933_v8, %v663_v60 }
 0x226   : > { %v686_v12 = vmul.f32 %v824_v10, %v677_v9 }
 0x227   : > { %v935_v11 = vpop.eup %934 }
 0x228   : > { %v678_v13 = vmul.f32 %v935_v11, %v664_v0  ;;  %v695_v16 = vadd.f32 %v825_v14, %v686_v12 }
 0x22a   : > { %v687_v15 = vmul.f32 %v824_v10, %v678_v13 }
 0x22c   : > { %v696_v17 = vadd.f32 %v825_v14, %v687_v15 }
 0x22e   : > { %v840_v18 = vpack.c.bf16 %v696_v17, %v695_v16 }
 0x230   : > { %841 = vst [vmem:[%s278_s14] sm:$0xff] %v840_v18  }
 0x231 PF: > { %s16_s21 = sadd.s32 1, %s942_s21  }
 0x232   : > { %p13_p4 = scmp.ge.s32.totalorder %s16_s21, 4  }
 0x234   :  { %15 = sbr.rel (!%p13_p4) target bundleno = 1 (0x1), region = 77 }

// kernel: vit_encoder_forward.19
= control target key start
LH: loop header
LB: loop body
LE: loop exit
PB: predicated region body
PF: predicated region fallthrough
CT: control target
= control target key end

     0   :  { %v257_v2 = vmov 0   ;;  %s336_s0 = inlined_call_operand.vmem [shape: bf16[2,128], index: 0, kind: input, shape index: {}]   ;;  %s337_s1 = inlined_call_operand.vmem [shape: bf16[128,256], index: 1, kind: input, shape index: {}]   ;;  %s338_s2 = inlined_call_operand.vmem [shape: f32[1,256], index: 2, kind: input, shape index: {}]   ;;  %s339_s3 = inlined_call_operand.hbm [shape: f32[2,256], index: 3, kind: output, shape index: {}]  }
   0x1   :  { %v211_v0 = vld [vmem:[%s337_s1 + $0x74] ss:$8 sps:$4 sm:$0xff]   ;;  %v213_v1 = vld [vmem:[%s337_s1 + $0x70] ss:$8 sps:$4 sm:$0xff]   ;;  %157 = vmatprep.mubr.bf16.mxu0 %v257_v2  ;;  %v214_v3 = vld [vmem:[%s337_s1 + $0x64] ss:$8 sps:$4 sm:$0xff]  }
   0x2   :  { %125 = vmatprep.subr.bf16.mxu0 %v211_v0  ;;  %v216_v4 = vld [vmem:[%s337_s1 + $0x60] ss:$8 sps:$4 sm:$0xff]   ;;  %v217_v5 = vld [vmem:[%s337_s1 + $0x54] ss:$8 sps:$4 sm:$0xff]   ;;  %v219_v6 = vld [vmem:[%s337_s1 + $0x50] ss:$8 sps:$4 sm:$0xff]  }
   0x3   :  { %126 = vmatpush1.bf16.msra.mxu0 %v213_v1  ;;  %v220_v7 = vld [vmem:[%s337_s1 + $0x44] ss:$8 sps:$4 sm:$0xff]   ;;  %v222_v8 = vld [vmem:[%s337_s1 + $0x40] ss:$8 sps:$4 sm:$0xff]  }
   0x4   :  { %127 = vmatprep.subr.bf16.mxu0 %v214_v3 }
   0x7   :  { %128 = vmatpush1.bf16.msra.mxu0 %v216_v4 }
   0x8   :  { %129 = vmatprep.subr.bf16.mxu0 %v217_v5 }
   0xb   :  { %130 = vmatpush1.bf16.msra.mxu0 %v219_v6 }
   0xc   :  { %8 = vsyncpa [#allocation3], 0  ;;  %131 = vmatprep.subr.bf16.mxu0 %v220_v7  ;;  %v223_v9 = vld [vmem:[%s337_s1 + $0x34] ss:$8 sps:$4 sm:$0xff]   ;;  %v225_v10 = vld [vmem:[%s337_s1 + $0x30] ss:$8 sps:$4 sm:$0xff]   ;;  %v35_v18 = vlaneseq }
   0xd   :  { %v226_v11 = vld [vmem:[%s337_s1 + $0x24] ss:$8 sps:$4 sm:$0xff]   ;;  %v228_v12 = vld [vmem:[%s337_s1 + $0x20] ss:$8 sps:$4 sm:$0xff]   ;;  %v229_v13 = vld [vmem:[%s337_s1 + $0x14] ss:$8 sps:$4 sm:$0xff]  }
   0xe   :  { %v231_v14 = vld [vmem:[%s337_s1 + $0x10] ss:$8 sps:$4 sm:$0xff]   ;;  %v232_v15 = vld [vmem:[%s337_s1 + $0x4] ss:$8 sps:$4 sm:$0xff]   ;;  %v234_v16 = vld [vmem:[%s337_s1] ss:$8 sps:$4 sm:$0xff]  }
   0xf   :  { %132 = vmatpush1.bf16.msra.mxu0 %v222_v8  ;;  %v16_v17 = vld [vmem:[%s336_s0] sm:$0x1]  ;;  %v36_v19 = vshrl.u32 %v35_v18, 7  ;;  %s258_s1 = smov [#allocation2]  }
  0x10   :  { %133 = vmatprep.subr.bf16.mxu0 %v223_v9  ;;  %v33_v22 = vld [vmem:[%s338_s2] sm:$0x3]  ;;  %s184_s21 = sshll.u32 %s258_s1, 4  ;;  %s185_s21 = int_to_ptr.vmem [resolvable:$true] %s184_s21 }
  0x11   :  { %v37_v20 = vsub.s32 0, %v36_v19  ;;  %v41_v21 = vsub.s32 1, %v36_v19  ;;  %s235_s0 = scalar_lea.vmem %s185_s21, 64  ;;  %p240_p1 = scmp.lt.s32.totalorder %s185_s21, %s185_s21 }
  0x12   :  { %p236_p0 = scmp.ne.s32.totalorder %s185_s21, %s235_s0  ;;  %p241_p2 = scmp.lt.s32.totalorder %s235_s0, %s235_s0 }
  0x13   :  { %134 = vmatpush1.bf16.msra.mxu0 %v225_v10  ;;  %v38_v23 = vrot.slane %v33_v22, %v37_v20  ;;  %v42_v24 = vrot.slane %v33_v22, %v41_v21 }
  0x14   :  { %135 = vmatprep.subr.bf16.mxu0 %v226_v11  ;;  %p242_p3 = por %p241_p2, %p240_p1 }
  0x16   :  { %p243_p4 = pnand %p242_p3, %p236_p0 }
  0x17   :  { %136 = vmatpush1.bf16.msra.mxu0 %v228_v12 }
  0x18   :  { %137 = vmatprep.subr.bf16.mxu0 %v229_v13 }
  0x1b   :  { %138 = vmatpush1.bf16.msra.mxu0 %v231_v14 }
  0x1c   :  { %139 = vmatprep.subr.bf16.mxu0 %v232_v15 }
  0x1f   :  { %140 = vmatpush1.bf16.msra.mxu0 %v234_v16 }
  0x22   :  { %158 = vmatmul.mubr.bf16.vlgmr.msra.gmra.mxu0 %v16_v17 }
  0xe2   :  { %v159_v25 = vpop.f32.mrf.mxu0 }
  0xe3   :  { %v160_v27 = vadd.f32 %v159_v25, %v38_v23 }
  0xe4   :  { %v161_v26 = vpop.f32.mrf.mxu0 }
  0xe5   :  { %v162_v28 = vadd.f32 %v161_v26, %v42_v24 }
  0xe6   :  { %v163_v29 = vpop.f32.mrf.mxu0 }
  0xe7   :  { %v168_v30 = vcombine.low %v160_v27, %v162_v28 }
  0xe8   :  { %v164_v31 = vpop.f32.mrf.mxu0 }
  0xe9   :  { %208 = vst.sshfl [vmem:[#allocation2] sm:$0x33 pattern:$0x76325410] %v168_v30 }
  0xea   :  { %246 = shalt.err (!%p243_p4)
}
  0xeb   :  { %187 = dma.vmem_to_hbm [thread:$0]  %s185_s21, 64, %s339_s3, [#allocation3]  }
  0xec   :  { %255 = dma.done.wait [#allocation3], 64  }
  0xed   :  { %256 = vsyncadd [#allocation3], 4294967232 }
  0xee   :  { %191 = vsyncpa [#allocation3], 1 }

</bundles_post_ra>
